<compile_context>
chip_gen: v5e
topology: v5e:2x2
jax: 0.10.0
libtpu: 0.0.40
codegen_flags: <defaults>
</compile_context>

<pallas_src>
import math

import jax
import jax.numpy as jnp
from jax.experimental import pallas as pl
from jax.experimental.pallas import tpu as pltpu


_MXU_DTYPE = jnp.bfloat16      # MXU input dtype (accumulation is always f32)


def _round_up(x, m):
    return (x + m - 1) // m * m


def _vmem_estimate(strip, W, Cin, Chid, Ck):
    """Rough per-step VMEM footprint (bytes) of the fused kernel for a given strip."""
    f32, bf16 = 4, 2
    m = strip * W
    wp = _round_up(W + 2, 8)
    scratch = (strip + 2) * wp * Chid * f32                 # hpad scratch
    live = ((strip + 2) * W * Chid * f32                    # h_all (fc1 result)
            + 2 * m * Chid * f32                            # conv acc + gelu result
            + m * Ck * f32)                                  # fc2 accumulation
    io = 2 * ((m + 2 * W) * Cin * f32 + m * Ck * f32)       # double-buffered in/out blocks
    wts = 2 * (Cin * Chid * bf16 + Chid * Ck * bf16
               + (9 + 2) * Chid * f32 + Ck * f32)            # double-buffered weights/biases
    return scratch + live + io + wts


def _pick_strip(H, W, Cin, Chid, Ck, budget_bytes):
    """Largest divisor of H whose fused-step footprint fits the VMEM budget.
    Prefers strips with a sublane-aligned token count (strip*W % 8 == 0)."""
    divisors = [d for d in range(H, 0, -1) if H % d == 0]
    aligned = [d for d in divisors if (d * W) % 8 == 0]
    pool = aligned if aligned else divisors
    for d in pool:
        if _vmem_estimate(d, W, Cin, Chid, Ck) <= budget_bytes:
            return d
    return pool[-1]


def _mlp_fused_kernel(x_ref, xt_ref, xb_ref, w1_ref, b1_ref, wdw_ref, bdw_ref,
                      w2_ref, b2_ref, o_ref, hpad_ref):
    # Per grid step (image b, row-strip s):
    #   x_ref   : (1, strip, W, Cin) f32   tokens of the strip
    #   xt_ref  : (1, 1, W, Cin)     f32   input row just above the strip (clamped)
    #   xb_ref  : (1, 1, W, Cin)     f32   input row just below the strip (clamped)
    #   w1_ref  : (Cin, Chid) bf16        b1_ref : (1, Chid) f32
    #   wdw_ref : (9, Chid)   f32         bdw_ref: (1, Chid) f32
    #   w2_ref  : (Chid, Ck)  bf16        b2_ref : (1, Ck)   f32
    #   o_ref   : (1, strip, W, Ck)
    #   hpad_ref: (strip+2, Wp>=W+2, Chid) f32 scratch (zero-padded hidden strip)
    _, strip, W, Cin = x_ref.shape
    Chid = w1_ref.shape[1]
    Ck = w2_ref.shape[1]
    M = strip * W

    s = pl.program_id(1)
    ns = pl.num_programs(1)

    # ---- fc1: one fused MXU matmul (bf16 in, f32 accumulate) over halo+strip rows ----
    x_all = jnp.concatenate(
        [xt_ref[...].reshape(W, Cin).astype(_MXU_DTYPE),
         x_ref[...].reshape(M, Cin).astype(_MXU_DTYPE),
         xb_ref[...].reshape(W, Cin).astype(_MXU_DTYPE)],
        axis=0)                                                    # ((strip+2)*W, Cin)
    h_all = jnp.dot(x_all, w1_ref[...], preferred_element_type=jnp.float32)
    h_all = h_all + b1_ref[...].astype(jnp.float32)                # ((strip+2)*W, Chid)

    # ---- write the zero-padded hidden strip into scratch with direct slice stores ----
    # Pad columns are re-zeroed every step (scratch persists across grid iterations).
    hpad_ref[:, 0:1, :] = jnp.zeros((strip + 2, 1, Chid), jnp.float32)
    hpad_ref[:, W + 1:W + 2, :] = jnp.zeros((strip + 2, 1, Chid), jnp.float32)
    hpad_ref[:, 1:W + 1, :] = h_all.reshape(strip + 2, W, Chid)

    # Halo rows that fall outside the image must be exact zeros: the conv's 'same' zero
    # padding acts on the hidden activation, so fc1(clamped row) + b1 would be wrong.
    @pl.when(s == 0)
    def _():
        hpad_ref[0:1, 1:W + 1, :] = jnp.zeros((1, W, Chid), jnp.float32)

    @pl.when(s == ns - 1)
    def _():
        hpad_ref[strip + 1:strip + 2, 1:W + 1, :] = jnp.zeros((1, W, Chid), jnp.float32)

    # ---- depthwise 3x3 conv (VPU, f32): 9 sliced reads of the padded scratch ----
    wdw = wdw_ref[...]                                   # (9, Chid)
    bdw = bdw_ref[...].reshape(1, 1, Chid)
    # accumulator initialised with tap 0 and the bias folded in (no zeros pass)
    acc = hpad_ref[0:strip, 0:W, :] * wdw[0].reshape(1, 1, Chid) + bdw
    for k in range(1, 9):
        kh, kw = divmod(k, 3)
        acc = acc + hpad_ref[kh:kh + strip, kw:kw + W, :] * wdw[k].reshape(1, 1, Chid)

    # ---- GELU: tanh approximation -> EUP slot (≈1e-3 delta vs torch's exact erf) ----
    h_act = jax.nn.gelu(acc, approximate=True)

    # ---- fc2 (MXU: bf16 in, f32 accumulate) ----
    out = jnp.dot(h_act.reshape(M, Chid).astype(w2_ref.dtype), w2_ref[...],
                  preferred_element_type=jnp.float32)
    out = out + b2_ref[...].astype(jnp.float32)
    o_ref[...] = out.reshape(1, strip, W, Ck).astype(o_ref.dtype)


def mlp_forward(x, H, W, params):
    """Segformer Mlp forward.  x: (B, N=H*W, Cin).
    params = (w1, b1, wdw, bdw, w2, b2) with w1: (Cin, Chid), wdw: (3, 3, Chid)
    (a PyTorch Conv2d depthwise weight (Chid, 1, 3, 3) must be permuted to (3, 3, Chid)),
    w2: (Chid, Cout)."""
    w1, b1, wdw, bdw, w2, b2 = params
    B, N, Cin = x.shape
    assert N == H * W, "sequence length must equal H*W"
    Chid = w1.shape[1]
    Cout = w2.shape[1]
    out_dtype = x.dtype

    # Lane-dense fc2 store: pad output channels to a multiple of 128 when the extra
    # writeback is at most ~2x (Cout >= 64).  For tiny Cout (demo: 8) the masked store
    # is cheaper than 16x more HBM write bytes, so keep the natural width.
    if Cout % 128 != 0 and Cout >= 64:
        Ck = Cout + (-Cout) % 128
    else:
        Ck = Cout

    # Per-generation VMEM budget (v7x: 64 MiB/TC; v5e/v6e: 128 MiB).
    try:
        vmem_cap = int(getattr(pltpu.get_tpu_info(), "vmem_capacity_bytes",
                               64 * 1024 * 1024))
    except Exception:
        vmem_cap = 64 * 1024 * 1024          # conservative (v7x) fallback
    vmem_budget = min(int(vmem_cap * 0.6), 96 * 1024 * 1024)

    strip = _pick_strip(H, W, Cin, Chid, Ck, vmem_budget)
    ns = H // strip
    Wp = _round_up(W + 2, 8)
    vmem_limit = int(min(max(vmem_budget,
                             int(_vmem_estimate(strip, W, Cin, Chid, Ck) * 1.5)),
                         vmem_cap))

    # x stays f32 in HBM (bf16 cast happens in-kernel); the reshape is free.
    x_img = x.reshape(B, H, W, Cin)

    w1c = w1.astype(_MXU_DTYPE)
    b1c = b1.astype(jnp.float32).reshape(1, Chid)
    wdwc = wdw.astype(jnp.float32).reshape(9, Chid)
    bdwc = bdw.astype(jnp.float32).reshape(1, Chid)
    w2c = jnp.pad(w2, ((0, 0), (0, Ck - Cout))).astype(_MXU_DTYPE)
    b2c = jnp.pad(b2, (0, Ck - Cout)).astype(jnp.float32).reshape(1, Ck)

    # Halo rows are fetched with clamped index_maps (boundary strips re-fetch an edge
    # row; the kernel zeroes the corresponding hidden row).
    def _top_map(b, s):
        return (b, jnp.maximum(s * strip - 1, 0), 0, 0)

    def _bot_map(b, s):
        return (b, jnp.minimum(s * strip + strip, H - 1), 0, 0)

    out = pl.pallas_call(
        _mlp_fused_kernel,
        out_shape=jax.ShapeDtypeStruct((B, H, W, Ck), out_dtype),
        grid_spec=pltpu.PrefetchScalarGridSpec(
            num_scalar_prefetch=0,
            grid=(B, ns),
            in_specs=[
                pl.BlockSpec((1, strip, W, Cin), lambda b, s: (b, s, 0, 0)),   # strip rows
                pl.BlockSpec((1, 1, W, Cin), _top_map),                        # halo above
                pl.BlockSpec((1, 1, W, Cin), _bot_map),                        # halo below
                pl.BlockSpec((Cin, Chid), lambda b, s: (0, 0)),                # w1
                pl.BlockSpec((1, Chid), lambda b, s: (0, 0)),                  # b1
                pl.BlockSpec((9, Chid), lambda b, s: (0, 0)),                  # dwconv weight
                pl.BlockSpec((1, Chid), lambda b, s: (0, 0)),                  # dwconv bias
                pl.BlockSpec((Chid, Ck), lambda b, s: (0, 0)),                 # w2 (maybe padded)
                pl.BlockSpec((1, Ck), lambda b, s: (0, 0)),                    # b2
            ],
            out_specs=pl.BlockSpec((1, strip, W, Ck), lambda b, s: (b, s, 0, 0)),
            scratch_shapes=[pltpu.VMEM((strip + 2, Wp, Chid), jnp.float32)],
        ),
        compiler_params=pltpu.CompilerParams(
            dimension_semantics=("parallel", "parallel"),   # independent blocks -> megacore
            vmem_limit_bytes=vmem_limit,
        ),
    )(x_img, x_img, x_img, w1c, b1c, wdwc, bdwc, w2c, b2c)

    out = out.reshape(B, N, Ck)
    if Ck != Cout:
        out = out[..., :Cout]
    return out


def mlp_reference(x, H, W, params):
    """Pure-JAX f32 reference mirroring the PyTorch module (exact-erf GELU)."""
    w1, b1, wdw, bdw, w2, b2 = params
    B, N, Cin = x.shape
    Chid = w1.shape[1]
    h = x.reshape(B * N, Cin) @ w1 + b1
    h = h.reshape(B, H, W, Chid)
    hp = jnp.pad(h, ((0, 0), (1, 1), (1, 1), (0, 0)))
    acc = jnp.zeros_like(h)
    for kh in range(3):
        for kw in range(3):
            acc = acc + hp[:, kh:kh + H, kw:kw + W, :] * wdw[kh, kw]
    acc = acc + bdw
    a = jax.nn.gelu(acc, approximate=False)
    out = a.reshape(B * N, Chid) @ w2 + b2
    return out.reshape(B, N, -1)


if __name__ == "__main__":
    key = jax.random.PRNGKey(0)
    B, H, W = 2, 16, 16
    in_features, hidden_features = 8, 32
    out_features = in_features
    N = H * W

    k1, k2, k3, k4, k5, k6, kx = jax.random.split(key, 7)
    # fc1: Linear(in -> hidden); weights stored (in, hidden) = transpose of torch (out, in).
    w1 = jax.random.normal(k1, (in_features, hidden_features), jnp.float32) * 0.02
    b1 = jax.random.normal(k4, (hidden_features,), jnp.float32) * 0.02
    # DWConv: Conv2d(hidden, hidden, 3, groups=hidden); fan_out = 3*3*hidden/hidden = 9.
    # (A PyTorch checkpoint weight of shape (hidden, 1, 3, 3) must be permuted to (3, 3, hidden).)
    fan_out = 3 * 3 * hidden_features // hidden_features
    wdw = jax.random.normal(k2, (3, 3, hidden_features), jnp.float32) * math.sqrt(2.0 / fan_out)
    bdw = jax.random.normal(k5, (hidden_features,), jnp.float32) * 0.02
    # fc2: Linear(hidden -> out)
    w2 = jax.random.normal(k3, (hidden_features, out_features), jnp.float32) * 0.02
    b2 = jax.random.normal(k6, (out_features,), jnp.float32) * 0.02
    # (The module init zeroes the biases; small nonzero biases are used here so the conv's
    #  hidden-space zero padding at strip boundaries is actually exercised by the self-test.)

    x = jax.random.normal(kx, (B, N, in_features), jnp.float32)
    params = (w1, b1, wdw, bdw, w2, b2)

    fwd = jax.jit(mlp_forward, static_argnums=(1, 2))
    out = fwd(x, H, W, params)
    jax.block_until_ready(out)
    assert out.shape == (B, N, out_features)

    # Loose tolerance: bf16 MXU inputs (f32 accumulation) + tanh-GELU vs the erf reference.
    ref = mlp_reference(x, H, W, params)
    max_err = float(jnp.max(jnp.abs(out - ref)))
    assert jnp.allclose(out, ref, atol=5e-3, rtol=5e-2), f"max |err| = {max_err}"

    print("KERNEL_OK")
</pallas_src>

<mosaic_0001>
module attributes {stable_mosaic.version = 11 : i64} {
  func.func @_mlp_fused_kernel(%arg0: i32, %arg1: i32, %arg2: memref<1x16x16x8xf32, #tpu.memory_space<vmem>>, %arg3: memref<1x1x16x8xf32, #tpu.memory_space<vmem>>, %arg4: memref<1x1x16x8xf32, #tpu.memory_space<vmem>>, %arg5: memref<8x32xbf16, #tpu.memory_space<vmem>>, %arg6: memref<1x32xf32, #tpu.memory_space<vmem>>, %arg7: memref<9x32xf32, #tpu.memory_space<vmem>>, %arg8: memref<1x32xf32, #tpu.memory_space<vmem>>, %arg9: memref<32x8xbf16, #tpu.memory_space<vmem>>, %arg10: memref<1x8xf32, #tpu.memory_space<vmem>>, %arg11: memref<1x16x16x8xf32, #tpu.memory_space<vmem>>, %arg12: memref<18x24x32xf32, #tpu.memory_space<vmem>>) attributes {dimension_semantics = [#tpu.dimension_semantics<parallel>, #tpu.dimension_semantics<parallel>], iteration_bounds = array<i64: 2, 1>, scalar_prefetch = 0 : i64, scratch_operands = 1 : i64, tpu.core_type = #tpu.core_type<tc>, window_params = [{transform_indices = @transform_0, window_bounds = array<i64: 1, 16, 16, 8>}, {transform_indices = @transform_1, window_bounds = array<i64: 1, 1, 16, 8>}, {transform_indices = @transform_2, window_bounds = array<i64: 1, 1, 16, 8>}, {pipeline_mode = #tpu.pipeline_mode<synchronous>, transform_indices = @transform_3, window_bounds = array<i64: 8, 32>}, {pipeline_mode = #tpu.pipeline_mode<synchronous>, transform_indices = @transform_4, window_bounds = array<i64: 1, 32>}, {pipeline_mode = #tpu.pipeline_mode<synchronous>, transform_indices = @transform_5, window_bounds = array<i64: 9, 32>}, {pipeline_mode = #tpu.pipeline_mode<synchronous>, transform_indices = @transform_6, window_bounds = array<i64: 1, 32>}, {pipeline_mode = #tpu.pipeline_mode<synchronous>, transform_indices = @transform_7, window_bounds = array<i64: 32, 8>}, {pipeline_mode = #tpu.pipeline_mode<synchronous>, transform_indices = @transform_8, window_bounds = array<i64: 1, 8>}, {transform_indices = @transform_9, window_bounds = array<i64: 1, 16, 16, 8>}]} {
    %c0 = arith.constant 0 : index
    %c0_0 = arith.constant 0 : index
    %c0_1 = arith.constant 0 : index
    %c0_2 = arith.constant 0 : index
    %0 = vector.load %arg3[%c0, %c0_0, %c0_1, %c0_2] : memref<1x1x16x8xf32, #tpu.memory_space<vmem>>, vector<1x1x16x8xf32>
    %1 = vector.shape_cast %0 : vector<1x1x16x8xf32> to vector<16x8xf32>
    %2 = arith.truncf %1 : vector<16x8xf32> to vector<16x8xbf16>
    %c0_3 = arith.constant 0 : index
    %c0_4 = arith.constant 0 : index
    %c0_5 = arith.constant 0 : index
    %c0_6 = arith.constant 0 : index
    %3 = vector.load %arg2[%c0_3, %c0_4, %c0_5, %c0_6] : memref<1x16x16x8xf32, #tpu.memory_space<vmem>>, vector<1x16x16x8xf32>
    %4 = vector.shape_cast %3 : vector<1x16x16x8xf32> to vector<256x8xf32>
    %5 = arith.truncf %4 : vector<256x8xf32> to vector<256x8xbf16>
    %c0_7 = arith.constant 0 : index
    %c0_8 = arith.constant 0 : index
    %c0_9 = arith.constant 0 : index
    %c0_10 = arith.constant 0 : index
    %6 = vector.load %arg4[%c0_7, %c0_8, %c0_9, %c0_10] : memref<1x1x16x8xf32, #tpu.memory_space<vmem>>, vector<1x1x16x8xf32>
    %7 = vector.shape_cast %6 : vector<1x1x16x8xf32> to vector<16x8xf32>
    %8 = arith.truncf %7 : vector<16x8xf32> to vector<16x8xbf16>
    %9 = tpu.concatenate %2, %5, %8 in 0 : vector<16x8xbf16>, vector<256x8xbf16>, vector<16x8xbf16> -> vector<288x8xbf16>
    %c0_11 = arith.constant 0 : index
    %c0_12 = arith.constant 0 : index
    %10 = vector.load %arg5[%c0_11, %c0_12] : memref<8x32xbf16, #tpu.memory_space<vmem>>, vector<8x32xbf16>
    %cst = arith.constant dense<0.000000e+00> : vector<288x32xf32>
    %11 = tpu.matmul %9, %10, %cst {dimension_numbers = #tpu.dot_dimension_numbers<[1], [0], [0], [1], [0, 0, 1, 1], [], []>} : vector<288x8xbf16>, vector<8x32xbf16>, vector<288x32xf32> -> vector<288x32xf32>
    %c0_13 = arith.constant 0 : index
    %c0_14 = arith.constant 0 : index
    %12 = vector.load %arg6[%c0_13, %c0_14] : memref<1x32xf32, #tpu.memory_space<vmem>>, vector<1x32xf32>
    %13 = vector.broadcast %12 : vector<1x32xf32> to vector<288x32xf32>
    %14 = arith.addf %11, %13 : vector<288x32xf32>
    %cst_15 = arith.constant 0.000000e+00 : f32
    %15 = vector.broadcast %cst_15 : f32 to vector<18x1x32xf32>
    %c0_16 = arith.constant 0 : index
    %c0_17 = arith.constant 0 : index
    %c0_18 = arith.constant 0 : index
    %16 = vector.load %arg12[%c0_16, %c0_17, %c0_18] : memref<18x24x32xf32, #tpu.memory_space<vmem>>, vector<18x1x32xf32>
    tpu.vector_store %arg12[%c0_16, %c0_17, %c0_18], %15 {strides = array<i32>} : memref<18x24x32xf32, #tpu.memory_space<vmem>>, vector<18x1x32xf32>,
    %cst_19 = arith.constant 0.000000e+00 : f32
    %17 = vector.broadcast %cst_19 : f32 to vector<18x1x32xf32>
    %c0_20 = arith.constant 0 : index
    %c17 = arith.constant 17 : index
    %c0_21 = arith.constant 0 : index
    %18 = vector.load %arg12[%c0_20, %c17, %c0_21] : memref<18x24x32xf32, #tpu.memory_space<vmem>>, vector<18x1x32xf32>
    tpu.vector_store %arg12[%c0_20, %c17, %c0_21], %17 {strides = array<i32>} : memref<18x24x32xf32, #tpu.memory_space<vmem>>, vector<18x1x32xf32>,
    %19 = vector.shape_cast %14 : vector<288x32xf32> to vector<18x16x32xf32>
    %c0_22 = arith.constant 0 : index
    %c1 = arith.constant 1 : index
    %c0_23 = arith.constant 0 : index
    %20 = vector.load %arg12[%c0_22, %c1, %c0_23] : memref<18x24x32xf32, #tpu.memory_space<vmem>>, vector<18x16x32xf32>
    tpu.vector_store %arg12[%c0_22, %c1, %c0_23], %19 {strides = array<i32>} : memref<18x24x32xf32, #tpu.memory_space<vmem>>, vector<18x16x32xf32>,
    %c0_i32 = arith.constant 0 : i32
    %21 = arith.cmpi eq, %arg1, %c0_i32 : i32
    %22 = arith.extui %21 : i1 to i32
    %c0_i32_24 = arith.constant 0 : i32
    %23 = arith.cmpi ne, %22, %c0_i32_24 : i32
    scf.if %23 {
      %cst_70 = arith.constant 0.000000e+00 : f32
      %116 = vector.broadcast %cst_70 : f32 to vector<1x16x32xf32>
      %c0_71 = arith.constant 0 : index
      %c1_72 = arith.constant 1 : index
      %c0_73 = arith.constant 0 : index
      %117 = vector.load %arg12[%c0_71, %c1_72, %c0_73] : memref<18x24x32xf32, #tpu.memory_space<vmem>>, vector<1x16x32xf32>
      tpu.vector_store %arg12[%c0_71, %c1_72, %c0_73], %116 {strides = array<i32>} : memref<18x24x32xf32, #tpu.memory_space<vmem>>, vector<1x16x32xf32>,
    } else {
    }
    %c0_i32_25 = arith.constant 0 : i32
    %24 = arith.cmpi eq, %arg1, %c0_i32_25 : i32
    %25 = arith.extui %24 : i1 to i32
    %c0_i32_26 = arith.constant 0 : i32
    %26 = arith.cmpi ne, %25, %c0_i32_26 : i32
    scf.if %26 {
      %cst_70 = arith.constant 0.000000e+00 : f32
      %116 = vector.broadcast %cst_70 : f32 to vector<1x16x32xf32>
      %c17_71 = arith.constant 17 : index
      %c1_72 = arith.constant 1 : index
      %c0_73 = arith.constant 0 : index
      %117 = vector.load %arg12[%c17_71, %c1_72, %c0_73] : memref<18x24x32xf32, #tpu.memory_space<vmem>>, vector<1x16x32xf32>
      tpu.vector_store %arg12[%c17_71, %c1_72, %c0_73], %116 {strides = array<i32>} : memref<18x24x32xf32, #tpu.memory_space<vmem>>, vector<1x16x32xf32>,
    } else {
    }
    %c0_27 = arith.constant 0 : index
    %c0_28 = arith.constant 0 : index
    %27 = vector.load %arg7[%c0_27, %c0_28] : memref<9x32xf32, #tpu.memory_space<vmem>>, vector<9x32xf32>
    %c0_29 = arith.constant 0 : index
    %c0_30 = arith.constant 0 : index
    %28 = vector.load %arg8[%c0_29, %c0_30] : memref<1x32xf32, #tpu.memory_space<vmem>>, vector<1x32xf32>
    %29 = vector.shape_cast %28 : vector<1x32xf32> to vector<1x1x32xf32>
    %c0_31 = arith.constant 0 : index
    %c0_32 = arith.constant 0 : index
    %c0_33 = arith.constant 0 : index
    %30 = vector.load %arg12[%c0_31, %c0_32, %c0_33] : memref<18x24x32xf32, #tpu.memory_space<vmem>>, vector<16x16x32xf32>
    %31 = vector.extract_strided_slice %27 {offsets = [0, 0], sizes = [1, 32], strides = [1, 1]} : vector<9x32xf32> to vector<1x32xf32>
    %32 = vector.shape_cast %31 : vector<1x32xf32> to vector<32xf32>
    %33 = vector.shape_cast %32 : vector<32xf32> to vector<1x1x32xf32>
    %34 = vector.broadcast %33 : vector<1x1x32xf32> to vector<16x16x32xf32>
    %35 = arith.mulf %30, %34 : vector<16x16x32xf32>
    %36 = vector.broadcast %29 : vector<1x1x32xf32> to vector<16x16x32xf32>
    %37 = arith.addf %35, %36 : vector<16x16x32xf32>
    %c0_34 = arith.constant 0 : index
    %c1_35 = arith.constant 1 : index
    %c0_36 = arith.constant 0 : index
    %38 = vector.load %arg12[%c0_34, %c1_35, %c0_36] : memref<18x24x32xf32, #tpu.memory_space<vmem>>, vector<16x16x32xf32>
    %39 = vector.extract_strided_slice %27 {offsets = [1, 0], sizes = [1, 32], strides = [1, 1]} : vector<9x32xf32> to vector<1x32xf32>
    %40 = vector.shape_cast %39 : vector<1x32xf32> to vector<32xf32>
    %41 = vector.shape_cast %40 : vector<32xf32> to vector<1x1x32xf32>
    %42 = vector.broadcast %41 : vector<1x1x32xf32> to vector<16x16x32xf32>
    %43 = arith.mulf %38, %42 : vector<16x16x32xf32>
    %44 = arith.addf %37, %43 : vector<16x16x32xf32>
    %c0_37 = arith.constant 0 : index
    %c2 = arith.constant 2 : index
    %c0_38 = arith.constant 0 : index
    %45 = vector.load %arg12[%c0_37, %c2, %c0_38] : memref<18x24x32xf32, #tpu.memory_space<vmem>>, vector<16x16x32xf32>
    %46 = vector.extract_strided_slice %27 {offsets = [2, 0], sizes = [1, 32], strides = [1, 1]} : vector<9x32xf32> to vector<1x32xf32>
    %47 = vector.shape_cast %46 : vector<1x32xf32> to vector<32xf32>
    %48 = vector.shape_cast %47 : vector<32xf32> to vector<1x1x32xf32>
    %49 = vector.broadcast %48 : vector<1x1x32xf32> to vector<16x16x32xf32>
    %50 = arith.mulf %45, %49 : vector<16x16x32xf32>
    %51 = arith.addf %44, %50 : vector<16x16x32xf32>
    %c1_39 = arith.constant 1 : index
    %c0_40 = arith.constant 0 : index
    %c0_41 = arith.constant 0 : index
    %52 = vector.load %arg12[%c1_39, %c0_40, %c0_41] : memref<18x24x32xf32, #tpu.memory_space<vmem>>, vector<16x16x32xf32>
    %53 = vector.extract_strided_slice %27 {offsets = [3, 0], sizes = [1, 32], strides = [1, 1]} : vector<9x32xf32> to vector<1x32xf32>
    %54 = vector.shape_cast %53 : vector<1x32xf32> to vector<32xf32>
    %55 = vector.shape_cast %54 : vector<32xf32> to vector<1x1x32xf32>
    %56 = vector.broadcast %55 : vector<1x1x32xf32> to vector<16x16x32xf32>
    %57 = arith.mulf %52, %56 : vector<16x16x32xf32>
    %58 = arith.addf %51, %57 : vector<16x16x32xf32>
    %c1_42 = arith.constant 1 : index
    %c1_43 = arith.constant 1 : index
    %c0_44 = arith.constant 0 : index
    %59 = vector.load %arg12[%c1_42, %c1_43, %c0_44] : memref<18x24x32xf32, #tpu.memory_space<vmem>>, vector<16x16x32xf32>
    %60 = vector.extract_strided_slice %27 {offsets = [4, 0], sizes = [1, 32], strides = [1, 1]} : vector<9x32xf32> to vector<1x32xf32>
    %61 = vector.shape_cast %60 : vector<1x32xf32> to vector<32xf32>
    %62 = vector.shape_cast %61 : vector<32xf32> to vector<1x1x32xf32>
    %63 = vector.broadcast %62 : vector<1x1x32xf32> to vector<16x16x32xf32>
    %64 = arith.mulf %59, %63 : vector<16x16x32xf32>
    %65 = arith.addf %58, %64 : vector<16x16x32xf32>
    %c1_45 = arith.constant 1 : index
    %c2_46 = arith.constant 2 : index
    %c0_47 = arith.constant 0 : index
    %66 = vector.load %arg12[%c1_45, %c2_46, %c0_47] : memref<18x24x32xf32, #tpu.memory_space<vmem>>, vector<16x16x32xf32>
    %67 = vector.extract_strided_slice %27 {offsets = [5, 0], sizes = [1, 32], strides = [1, 1]} : vector<9x32xf32> to vector<1x32xf32>
    %68 = vector.shape_cast %67 : vector<1x32xf32> to vector<32xf32>
    %69 = vector.shape_cast %68 : vector<32xf32> to vector<1x1x32xf32>
    %70 = vector.broadcast %69 : vector<1x1x32xf32> to vector<16x16x32xf32>
    %71 = arith.mulf %66, %70 : vector<16x16x32xf32>
    %72 = arith.addf %65, %71 : vector<16x16x32xf32>
    %c2_48 = arith.constant 2 : index
    %c0_49 = arith.constant 0 : index
    %c0_50 = arith.constant 0 : index
    %73 = vector.load %arg12[%c2_48, %c0_49, %c0_50] : memref<18x24x32xf32, #tpu.memory_space<vmem>>, vector<16x16x32xf32>
    %74 = vector.extract_strided_slice %27 {offsets = [6, 0], sizes = [1, 32], strides = [1, 1]} : vector<9x32xf32> to vector<1x32xf32>
    %75 = vector.shape_cast %74 : vector<1x32xf32> to vector<32xf32>
    %76 = vector.shape_cast %75 : vector<32xf32> to vector<1x1x32xf32>
    %77 = vector.broadcast %76 : vector<1x1x32xf32> to vector<16x16x32xf32>
    %78 = arith.mulf %73, %77 : vector<16x16x32xf32>
    %79 = arith.addf %72, %78 : vector<16x16x32xf32>
    %c2_51 = arith.constant 2 : index
    %c1_52 = arith.constant 1 : index
    %c0_53 = arith.constant 0 : index
    %80 = vector.load %arg12[%c2_51, %c1_52, %c0_53] : memref<18x24x32xf32, #tpu.memory_space<vmem>>, vector<16x16x32xf32>
    %81 = vector.extract_strided_slice %27 {offsets = [7, 0], sizes = [1, 32], strides = [1, 1]} : vector<9x32xf32> to vector<1x32xf32>
    %82 = vector.shape_cast %81 : vector<1x32xf32> to vector<32xf32>
    %83 = vector.shape_cast %82 : vector<32xf32> to vector<1x1x32xf32>
    %84 = vector.broadcast %83 : vector<1x1x32xf32> to vector<16x16x32xf32>
    %85 = arith.mulf %80, %84 : vector<16x16x32xf32>
    %86 = arith.addf %79, %85 : vector<16x16x32xf32>
    %c2_54 = arith.constant 2 : index
    %c2_55 = arith.constant 2 : index
    %c0_56 = arith.constant 0 : index
    %87 = vector.load %arg12[%c2_54, %c2_55, %c0_56] : memref<18x24x32xf32, #tpu.memory_space<vmem>>, vector<16x16x32xf32>
    %88 = vector.extract_strided_slice %27 {offsets = [8, 0], sizes = [1, 32], strides = [1, 1]} : vector<9x32xf32> to vector<1x32xf32>
    %89 = vector.shape_cast %88 : vector<1x32xf32> to vector<32xf32>
    %90 = vector.shape_cast %89 : vector<32xf32> to vector<1x1x32xf32>
    %91 = vector.broadcast %90 : vector<1x1x32xf32> to vector<16x16x32xf32>
    %92 = arith.mulf %87, %91 : vector<16x16x32xf32>
    %93 = arith.addf %86, %92 : vector<16x16x32xf32>
    %94 = arith.mulf %93, %93 : vector<16x16x32xf32>
    %95 = arith.mulf %93, %94 : vector<16x16x32xf32>
    %cst_57 = arith.constant 4.471500e-02 : f32
    %96 = vector.broadcast %cst_57 : f32 to vector<16x16x32xf32>
    %97 = arith.mulf %96, %95 : vector<16x16x32xf32>
    %98 = arith.addf %93, %97 : vector<16x16x32xf32>
    %cst_58 = arith.constant 0.797884583 : f32
    %99 = vector.broadcast %cst_58 : f32 to vector<16x16x32xf32>
    %100 = arith.mulf %99, %98 : vector<16x16x32xf32>
    %101 = math.tanh %100 : vector<16x16x32xf32>
    %cst_59 = arith.constant 1.000000e+00 : f32
    %102 = vector.broadcast %cst_59 : f32 to vector<16x16x32xf32>
    %103 = arith.addf %102, %101 : vector<16x16x32xf32>
    %cst_60 = arith.constant 5.000000e-01 : f32
    %104 = vector.broadcast %cst_60 : f32 to vector<16x16x32xf32>
    %105 = arith.mulf %104, %103 : vector<16x16x32xf32>
    %106 = arith.mulf %93, %105 : vector<16x16x32xf32>
    %107 = vector.shape_cast %106 : vector<16x16x32xf32> to vector<256x32xf32>
    %108 = arith.truncf %107 : vector<256x32xf32> to vector<256x32xbf16>
    %c0_61 = arith.constant 0 : index
    %c0_62 = arith.constant 0 : index
    %109 = vector.load %arg9[%c0_61, %c0_62] : memref<32x8xbf16, #tpu.memory_space<vmem>>, vector<32x8xbf16>
    %cst_63 = arith.constant dense<0.000000e+00> : vector<256x8xf32>
    %110 = tpu.matmul %108, %109, %cst_63 {dimension_numbers = #tpu.dot_dimension_numbers<[1], [0], [0], [1], [0, 0, 1, 1], [], []>} : vector<256x32xbf16>, vector<32x8xbf16>, vector<256x8xf32> -> vector<256x8xf32>
    %c0_64 = arith.constant 0 : index
    %c0_65 = arith.constant 0 : index
    %111 = vector.load %arg10[%c0_64, %c0_65] : memref<1x8xf32, #tpu.memory_space<vmem>>, vector<1x8xf32>
    %112 = vector.broadcast %111 : vector<1x8xf32> to vector<256x8xf32>
    %113 = arith.addf %110, %112 : vector<256x8xf32>
    %114 = vector.shape_cast %113 : vector<256x8xf32> to vector<1x16x16x8xf32>
    %c0_66 = arith.constant 0 : index
    %c0_67 = arith.constant 0 : index
    %c0_68 = arith.constant 0 : index
    %c0_69 = arith.constant 0 : index
    %115 = vector.load %arg11[%c0_66, %c0_67, %c0_68, %c0_69] : memref<1x16x16x8xf32, #tpu.memory_space<vmem>>, vector<1x16x16x8xf32>
    tpu.vector_store %arg11[%c0_66, %c0_67, %c0_68, %c0_69], %114 {strides = array<i32>} : memref<1x16x16x8xf32, #tpu.memory_space<vmem>>, vector<1x16x16x8xf32>,
    return
  }
  func.func @transform_0(%arg0: i32, %arg1: i32) -> (i32, i32, i32, i32) {
    %c0_i32 = arith.constant 0 : i32
    %c0_i32_0 = arith.constant 0 : i32
    %c0_i32_1 = arith.constant 0 : i32
    return %arg0, %arg1, %c0_i32, %c0_i32_0 : i32, i32, i32, i32
  }
  func.func @transform_1(%arg0: i32, %arg1: i32) -> (i32, i32, i32, i32) {
    %c16_i32 = arith.constant 16 : i32
    %0 = arith.muli %arg1, %c16_i32 : i32
    %c1_i32 = arith.constant 1 : i32
    %1 = arith.subi %0, %c1_i32 : i32
    %c0_i32 = arith.constant 0 : i32
    %2 = arith.maxsi %1, %c0_i32 : i32
    %c0_i32_0 = arith.constant 0 : i32
    %c0_i32_1 = arith.constant 0 : i32
    %c0_i32_2 = arith.constant 0 : i32
    return %arg0, %2, %c0_i32_0, %c0_i32_1 : i32, i32, i32, i32
  }
  func.func @transform_2(%arg0: i32, %arg1: i32) -> (i32, i32, i32, i32) {
    %c16_i32 = arith.constant 16 : i32
    %0 = arith.muli %arg1, %c16_i32 : i32
    %c16_i32_0 = arith.constant 16 : i32
    %1 = arith.addi %0, %c16_i32_0 : i32
    %c15_i32 = arith.constant 15 : i32
    %2 = arith.minsi %1, %c15_i32 : i32
    %c0_i32 = arith.constant 0 : i32
    %c0_i32_1 = arith.constant 0 : i32
    %c0_i32_2 = arith.constant 0 : i32
    return %arg0, %2, %c0_i32, %c0_i32_1 : i32, i32, i32, i32
  }
  func.func @transform_3(%arg0: i32, %arg1: i32) -> (i32, i32) {
    %c0_i32 = arith.constant 0 : i32
    %c0_i32_0 = arith.constant 0 : i32
    %c0_i32_1 = arith.constant 0 : i32
    return %c0_i32, %c0_i32_0 : i32, i32
  }
  func.func @transform_4(%arg0: i32, %arg1: i32) -> (i32, i32) {
    %c0_i32 = arith.constant 0 : i32
    %c0_i32_0 = arith.constant 0 : i32
    %c0_i32_1 = arith.constant 0 : i32
    return %c0_i32, %c0_i32_0 : i32, i32
  }
  func.func @transform_5(%arg0: i32, %arg1: i32) -> (i32, i32) {
    %c0_i32 = arith.constant 0 : i32
    %c0_i32_0 = arith.constant 0 : i32
    %c0_i32_1 = arith.constant 0 : i32
    return %c0_i32, %c0_i32_0 : i32, i32
  }
  func.func @transform_6(%arg0: i32, %arg1: i32) -> (i32, i32) {
    %c0_i32 = arith.constant 0 : i32
    %c0_i32_0 = arith.constant 0 : i32
    %c0_i32_1 = arith.constant 0 : i32
    return %c0_i32, %c0_i32_0 : i32, i32
  }
  func.func @transform_7(%arg0: i32, %arg1: i32) -> (i32, i32) {
    %c0_i32 = arith.constant 0 : i32
    %c0_i32_0 = arith.constant 0 : i32
    %c0_i32_1 = arith.constant 0 : i32
    return %c0_i32, %c0_i32_0 : i32, i32
  }
  func.func @transform_8(%arg0: i32, %arg1: i32) -> (i32, i32) {
    %c0_i32 = arith.constant 0 : i32
    %c0_i32_0 = arith.constant 0 : i32
    %c0_i32_1 = arith.constant 0 : i32
    return %c0_i32, %c0_i32_0 : i32, i32
  }
  func.func @transform_9(%arg0: i32, %arg1: i32) -> (i32, i32, i32, i32) {
    %c0_i32 = arith.constant 0 : i32
    %c0_i32_0 = arith.constant 0 : i32
    %c0_i32_1 = arith.constant 0 : i32
    return %arg0, %arg1, %c0_i32, %c0_i32_0 : i32, i32, i32, i32
  }
}

</mosaic_0001>

<bundles_post_ra>
// kernel: mlp_forward.1
= control target key start
LH: loop header
LB: loop body
LE: loop exit
PB: predicated region body
PF: predicated region fallthrough
CT: control target
= control target key end

     0   :  { %s2662_s30 = smov 0   ;;  %s2664_s10 = smov 0   ;;  %s4032_s0 = inlined_call_operand.vmem [shape: f32[2,16,16,8], index: 0, kind: input, shape index: {}, may-alias: {0,1,2}]   ;;  %s4033_s1 = inlined_call_operand.vmem [shape: f32[2,16,16,8], index: 1, kind: input, shape index: {}, may-alias: {0,1,2}]   ;;  %s4034_s2 = inlined_call_operand.vmem [shape: f32[2,16,16,8], index: 2, kind: input, shape index: {}, may-alias: {0,1,2}]   ;;  %s4035_s3 = inlined_call_operand.vmem [shape: bf16[8,32], index: 3, kind: input, shape index: {}]   ;;  %s4036_s4 = inlined_call_operand.vmem [shape: f32[1,32], index: 4, kind: input, shape index: {}]   ;;  %s4037_s5 = inlined_call_operand.vmem [shape: f32[9,32], index: 5, kind: input, shape index: {}]   ;;  %s4038_s6 = inlined_call_operand.vmem [shape: f32[1,32], index: 6, kind: input, shape index: {}]   ;;  %s4039_s7 = inlined_call_operand.vmem [shape: bf16[32,8], index: 7, kind: input, shape index: {}]   ;;  %s4040_s8 = inlined_call_operand.vmem [shape: f32[1,8], index: 8, kind: input, shape index: {}]   ;;  %s4041_s9 = inlined_call_operand.vmem [shape: f32[2,16,16,8], index: 9, kind: output, shape index: {}]  }
   0x1   :  { %s2666_s11 = smov 0  }
   0x2 LB: > { %s31_s12 = sadd.s32 1, %s2605_s10  ;;  %p2426_p0 = scmp.ge.s32.totalorder %s2609_s11, 1  ;;  %s2609_s11 = sphi %s2666_s11, %s19_s11   ;;  %s2605_s10 = sphi %s2664_s10, %s4062_s10   ;;  %s2601_s30 = sphi %s2662_s30, %s4061_s30  }
   0x3   : > { %p33_p1 = scmp.ge.s32.totalorder %s31_s12, 2  ;;  %p373_p2 = scmp.lt.s32.totalorder %s2609_s11, 3 }
   0x5   : > { %s4064_s12 = smov (%p33_p1, %s31_s12), 0  ;;  %p374_p3 = pnand %p2426_p0, %p373_p2 }
   0x7   : > { %377 = sbr.rel (%p374_p3) target bundleno = 568 (0x238), region = 56 }
   0xc   : > { %v664_v0 = vld [vmem:[%s4035_s3] sm:$0xf]  ;;  %vm724_vm0 = vcmask 1043456   ;;  %p446_p4 = scmp.lt.s32.totalorder %s2601_s30, 1  ;;  %vm669_vm1 = vcmask 64512   ;;  %vm827_vm2 = vcmask 253952  }
   0xd   : > { %v726_v1 = vsel %vm724_vm0, %v664_v0, 0  ;;  %vm864_vm3 = vcmask 261120  }
   0xe   : > { %735 = vmatpush.bf16.msra.mxu0 %v726_v1  ;;  %2487 = vmatpush.bf16.msra.mxu2 %v726_v1  ;;  %s4066_s30 = smov (!%p446_p4, %s2601_s30), 1 }
   0xf   : > { %s2683_s15 = sshll.u32 %s4066_s30, 8 }
  0x10   : > { %s2689_s18 = scalar_lea.vmem %s4032_s0, %s2683_s15  ;;  %s468_s21 = scalar_lea.vmem %s4033_s1, %s2683_s15 }
  0x11   : > { %v502_v2 = vld [vmem:[%s468_s21] sm:$0xff]  ;;  %v503_v3 = vld [vmem:[%s468_s21 + $0x8] sm:$0xff]  ;;  %v524_v18 = vld [vmem:[%s2689_s18 + $0x90] sm:$0xff]  ;;  %s2482_s22 = sadd.s32 240, %s2683_s15  ;;  %s3874_s13 = scalar_lea.vmem %s4041_s9, %s2683_s15 }
  0x12   : > { %v522_v4 = vld [vmem:[%s2689_s18 + $0x80] sm:$0xff]  ;;  %v504_v5 = vpack.c.bf16 %v502_v2, %v502_v2  ;;  %v505_v6 = vpack.c.bf16 %v503_v3, %v503_v3  ;;  %v523_v7 = vld [vmem:[%s2689_s18 + $0x88] sm:$0xff]  ;;  %v525_v19 = vld [vmem:[%s2689_s18 + $0x98] sm:$0xff]  ;;  %v556_v22 = vpack.c.bf16 %v524_v18, %v524_v18  ;;  %s485_s25 = scalar_lea.vmem %s4034_s2, %s2482_s22 }
  0x13   : > { %v554_v8 = vpack.c.bf16 %v522_v4, %v522_v4  ;;  %v555_v9 = vpack.c.bf16 %v523_v7, %v523_v7  ;;  %v506_v16 = vld [vmem:[%s2689_s18] sm:$0xff]  ;;  %v507_v17 = vld [vmem:[%s2689_s18 + $0x8] sm:$0xff]  ;;  %v557_v23 = vpack.c.bf16 %v525_v19, %v525_v19  ;;  %v508_v30 = vld [vmem:[%s2689_s18 + $0x10] sm:$0xff] }
  0x14   : > { %v576_v10 = vunpack.c.l.b16 %v504_v5  ;;  %v577_v11 = vunpack.c.l.b16 %v505_v6  ;;  %v538_v20 = vpack.c.bf16 %v506_v16, %v506_v16  ;;  %v539_v21 = vpack.c.bf16 %v507_v17, %v507_v17  ;;  %v509_v31 = vld [vmem:[%s2689_s18 + $0x18] sm:$0xff]  ;;  %v526_v32 = vld [vmem:[%s2689_s18 + $0xa0] sm:$0xff]  ;;  %v527_v33 = vld [vmem:[%s2689_s18 + $0xa8] sm:$0xff] }
  0x15   : > { %v627_v12 = vunpack.c.l.b16 %v554_v8  ;;  %v628_v13 = vunpack.c.l.b16 %v555_v9  ;;  %v629_v26 = vunpack.c.l.b16 %v556_v22  ;;  %v630_v27 = vunpack.c.l.b16 %v557_v23  ;;  %v510_v44 = vld [vmem:[%s2689_s18 + $0x20] sm:$0xff]  ;;  %v511_v45 = vld [vmem:[%s2689_s18 + $0x28] sm:$0xff]  ;;  %v528_v46 = vld [vmem:[%s2689_s18 + $0xb0] sm:$0xff] }
  0x16   : > { %v578_v14 = vpack.c.b16 %v577_v11, %v576_v10  ;;  %v611_v24 = vunpack.c.l.b16 %v538_v20  ;;  %v612_v25 = vunpack.c.l.b16 %v539_v21  ;;  %v540_v34 = vpack.c.bf16 %v508_v30, %v508_v30  ;;  %v529_v47 = vld [vmem:[%s2689_s18 + $0xb8] sm:$0xff]  ;;  %v512_v58 = vld [vmem:[%s2689_s18 + $0x30] sm:$0xff]  ;;  %v530_v60 = vld [vmem:[%s2689_s18 + $0xc0] sm:$0xff] }
  0x17   : > { %v651_v15 = vpack.c.b16 %v628_v13, %v627_v12  ;;  %v652_v29 = vpack.c.b16 %v630_v27, %v629_v26  ;;  %v541_v35 = vpack.c.bf16 %v509_v31, %v509_v31  ;;  %v558_v36 = vpack.c.bf16 %v526_v32, %v526_v32  ;;  %v513_v59 = vld [vmem:[%s2689_s18 + $0x38] sm:$0xff]  ;;  %v531_v61 = vld [vmem:[%s2689_s18 + $0xc8] sm:$0xff]  ;;  %v514_v8 = vld [vmem:[%s2689_s18 + $0x40] sm:$0xff] }
  0x18   : > { %2435 = vmatmul.msk.bf16.vlgmr.msra.gmra.mxu0 %vm669_vm1, %v578_v14  ;;  %v643_v28 = vpack.c.b16 %v612_v25, %v611_v24  ;;  %v559_v37 = vpack.c.bf16 %v527_v33, %v527_v33  ;;  %v613_v38 = vunpack.c.l.b16 %v540_v34  ;;  %v542_v48 = vpack.c.bf16 %v510_v44, %v510_v44  ;;  %v515_v9 = vld [vmem:[%s2689_s18 + $0x48] sm:$0xff]  ;;  %v532_v10 = vld [vmem:[%s2689_s18 + $0xd0] sm:$0xff]  ;;  %v533_v11 = vld [vmem:[%s2689_s18 + $0xd8] sm:$0xff] }
  0x19   : > { %2444 = vmatmul.msk.bf16.vlgmr.msra.gmra.mxu2 %vm669_vm1, %v651_v15  ;;  %v614_v39 = vunpack.c.l.b16 %v541_v35  ;;  %v631_v40 = vunpack.c.l.b16 %v558_v36  ;;  %v543_v49 = vpack.c.bf16 %v511_v45, %v511_v45  ;;  %v560_v50 = vpack.c.bf16 %v528_v46, %v528_v46  ;;  %v516_v22 = vld [vmem:[%s2689_s18 + $0x50] sm:$0xff]  ;;  %v517_v23 = vld [vmem:[%s2689_s18 + $0x58] sm:$0xff]  ;;  %v534_v24 = vld [vmem:[%s2689_s18 + $0xe0] sm:$0xff] }
  0x1a   : > { %v632_v41 = vunpack.c.l.b16 %v559_v37  ;;  %v561_v51 = vpack.c.bf16 %v529_v47, %v529_v47  ;;  %v615_v52 = vunpack.c.l.b16 %v542_v48  ;;  %v544_v62 = vpack.c.bf16 %v512_v58, %v512_v58  ;;  %v535_v25 = vld [vmem:[%s2689_s18 + $0xe8] sm:$0xff]  ;;  %v518_v36 = vld [vmem:[%s2689_s18 + $0x60] sm:$0xff] }
  0x1b   : > { %v644_v42 = vpack.c.b16 %v614_v39, %v613_v38  ;;  %v616_v53 = vunpack.c.l.b16 %v543_v49  ;;  %v633_v54 = vunpack.c.l.b16 %v560_v50  ;;  %v545_v63 = vpack.c.bf16 %v513_v59, %v513_v59  ;;  %v519_v37 = vld [vmem:[%s2689_s18 + $0x68] sm:$0xff]  ;;  %v536_v38 = vld [vmem:[%s2689_s18 + $0xf0] sm:$0xff]  ;;  %v537_v39 = vld [vmem:[%s2689_s18 + $0xf8] sm:$0xff] }
  0x1c   : > { %v653_v43 = vpack.c.b16 %v632_v41, %v631_v40  ;;  %v634_v55 = vunpack.c.l.b16 %v561_v51  ;;  %v562_v0 = vpack.c.bf16 %v530_v60, %v530_v60  ;;  %v563_v1 = vpack.c.bf16 %v531_v61, %v531_v61  ;;  %v520_v51 = vld [vmem:[%s2689_s18 + $0x70] sm:$0xff] }
  0x1d   : > { %v645_v56 = vpack.c.b16 %v616_v53, %v615_v52  ;;  %v617_v2 = vunpack.c.l.b16 %v544_v62  ;;  %v618_v3 = vunpack.c.l.b16 %v545_v63  ;;  %v546_v12 = vpack.c.bf16 %v514_v8, %v514_v8  ;;  %v521_v52 = vld [vmem:[%s2689_s18 + $0x78] sm:$0xff]  ;;  %v570_v53 = vld [vmem:[%s485_s25] sm:$0xff] }
  0x1e   : > { %v654_v57 = vpack.c.b16 %v634_v55, %v633_v54  ;;  %v635_v4 = vunpack.c.l.b16 %v562_v0  ;;  %v636_v5 = vunpack.c.l.b16 %v563_v1  ;;  %v547_v13 = vpack.c.bf16 %v515_v9, %v515_v9  ;;  %v571_v54 = vld [vmem:[%s485_s25 + $0x8] sm:$0xff]  ;;  %v2780_v63 = vld [vmem:[%s4036_s4] ss:$0 sm:$0xff] }
  0x1f   : > { %v646_v6 = vpack.c.b16 %v618_v3, %v617_v2  ;;  %v564_v14 = vpack.c.bf16 %v532_v10, %v532_v10  ;;  %v565_v15 = vpack.c.bf16 %v533_v11, %v533_v11  ;;  %v619_v16 = vunpack.c.l.b16 %v546_v12  ;;  %v2817_v8 = vld [vmem:[%s4037_s5] sm:$0xff] }
  0x20   : > { %v655_v7 = vpack.c.b16 %v636_v5, %v635_v4  ;;  %v620_v17 = vunpack.c.l.b16 %v547_v13  ;;  %v548_v26 = vpack.c.bf16 %v516_v22, %v516_v22  ;;  %v549_v27 = vpack.c.bf16 %v517_v23, %v517_v23 }
  0x21   : > { %v637_v18 = vunpack.c.l.b16 %v564_v14  ;;  %v638_v19 = vunpack.c.l.b16 %v565_v15  ;;  %v550_v40 = vpack.c.bf16 %v518_v36, %v518_v36  ;;  %v551_v41 = vpack.c.bf16 %v519_v37, %v519_v37 }
  0x22   : > { %v647_v20 = vpack.c.b16 %v620_v17, %v619_v16  ;;  %v621_v30 = vunpack.c.l.b16 %v548_v26  ;;  %v622_v31 = vunpack.c.l.b16 %v549_v27  ;;  %v4042_v48 = vmov 0.0   ;;  %v2841_v17 = vld [vmem:[%s4038_s6] ss:$0 sm:$0xff] }
  0x23   : > { %v656_v21 = vpack.c.b16 %v638_v19, %v637_v18  ;;  %v623_v44 = vunpack.c.l.b16 %v550_v40  ;;  %v624_v45 = vunpack.c.l.b16 %v551_v41  ;;  %828 = vst.msk [vmem:[#allocation2] sm:$0x1] %vm827_vm2, %v4042_v48  ;;  %v552_v55 = vpack.c.bf16 %v520_v51, %v520_v51 }
  0x24   : > { %v648_v34 = vpack.c.b16 %v622_v31, %v621_v30  ;;  %829 = vst.msk [vmem:[#allocation2 + $0x18] sm:$0x1] %vm827_vm2, %v4042_v48  ;;  %v573_v58 = vpack.c.bf16 %v571_v54, %v571_v54  ;;  %v2824_v9 = vperm.slane %v2817_v8, 0  ;;  %v2844_v18 = vperm.slane %v2817_v8, 1 }
  0x25   : > { %v649_v49 = vpack.c.b16 %v624_v45, %v623_v44  ;;  %830 = vst.msk [vmem:[#allocation2 + $0x30] sm:$0x1] %vm827_vm2, %v4042_v48  ;;  %v625_v59 = vunpack.c.l.b16 %v552_v55  ;;  %v2856_v27 = vperm.slane %v2817_v8, 2  ;;  %v2880_v51 = vperm.slane %v2817_v8, 4 }
  0x26   : > { %846 = vst.msk [vmem:[#allocation2 + $0x11] sm:$0x1] %vm827_vm2, %v4042_v48  ;;  %v662_v62 = vunpack.c.l.b16 %v573_v58 }
  0x27   : > { %847 = vst.msk [vmem:[#allocation2 + $0x29] sm:$0x1] %vm827_vm2, %v4042_v48 }
  0x28   : > { %2436 = vmatmul.msk.bf16.gmra.mxu0 %vm669_vm1, %v643_v28  ;;  %v566_v28 = vpack.c.bf16 %v534_v24, %v534_v24  ;;  %848 = vst.msk [vmem:[#allocation2 + $0x41] sm:$0x1] %vm827_vm2, %v4042_v48 }
  0x29   : > { %2445 = vmatmul.msk.bf16.gmra.mxu2 %vm669_vm1, %v652_v29  ;;  %v567_v29 = vpack.c.bf16 %v535_v25, %v535_v25  ;;  %831 = vst.msk [vmem:[#allocation2 + $0x48] sm:$0x1] %vm827_vm2, %v4042_v48 }
  0x2a   : > { %v639_v32 = vunpack.c.l.b16 %v566_v28  ;;  %832 = vst.msk [vmem:[#allocation2 + $0x60] sm:$0x1] %vm827_vm2, %v4042_v48 }
  0x2b   : > { %v640_v33 = vunpack.c.l.b16 %v567_v29  ;;  %833 = vst.msk [vmem:[#allocation2 + $0x78] sm:$0x1] %vm827_vm2, %v4042_v48 }
  0x2c   : > { %834 = vst.msk [vmem:[#allocation2 + $0x90] sm:$0x1] %vm827_vm2, %v4042_v48 }
  0x2d   : > { %v657_v35 = vpack.c.b16 %v640_v33, %v639_v32  ;;  %835 = vst.msk [vmem:[#allocation2 + $0xa8] sm:$0x1] %vm827_vm2, %v4042_v48 }
  0x2e   : > { %836 = vst.msk [vmem:[#allocation2 + $0xc0] sm:$0x1] %vm827_vm2, %v4042_v48 }
  0x2f   : > { %837 = vst.msk [vmem:[#allocation2 + $0xd8] sm:$0x1] %vm827_vm2, %v4042_v48 }
  0x30   : > { %838 = vst.msk [vmem:[#allocation2 + $0xf0] sm:$0x1] %vm827_vm2, %v4042_v48 }
  0x31   : > { %839 = vst.msk [vmem:[#allocation2 + $0x108] sm:$0x1] %vm827_vm2, %v4042_v48 }
  0x32   : > { %840 = vst.msk [vmem:[#allocation2 + $0x120] sm:$0x1] %vm827_vm2, %v4042_v48 }
  0x33   : > { %841 = vst.msk [vmem:[#allocation2 + $0x138] sm:$0x1] %vm827_vm2, %v4042_v48 }
  0x34   : > { %842 = vst.msk [vmem:[#allocation2 + $0x150] sm:$0x1] %vm827_vm2, %v4042_v48 }
  0x35   : > { %843 = vst.msk [vmem:[#allocation2 + $0x168] sm:$0x1] %vm827_vm2, %v4042_v48 }
  0x36   : > { %844 = vst.msk [vmem:[#allocation2 + $0x180] sm:$0x1] %vm827_vm2, %v4042_v48 }
  0x37   : > { %845 = vst.msk [vmem:[#allocation2 + $0x198] sm:$0x1] %vm827_vm2, %v4042_v48 }
  0x38   : > { %2437 = vmatmul.msk.bf16.gmra.mxu0 %vm669_vm1, %v644_v42  ;;  %v568_v42 = vpack.c.bf16 %v536_v38, %v536_v38  ;;  %849 = vst.msk [vmem:[#allocation2 + $0x59] sm:$0x1] %vm827_vm2, %v4042_v48 }
  0x39   : > { %2446 = vmatmul.msk.bf16.gmra.mxu2 %vm669_vm1, %v653_v43  ;;  %v569_v43 = vpack.c.bf16 %v537_v39, %v537_v39  ;;  %850 = vst.msk [vmem:[#allocation2 + $0x71] sm:$0x1] %vm827_vm2, %v4042_v48 }
  0x3a   : > { %v641_v46 = vunpack.c.l.b16 %v568_v42  ;;  %851 = vst.msk [vmem:[#allocation2 + $0x89] sm:$0x1] %vm827_vm2, %v4042_v48  ;;  %v2873_v42 = vperm.slane %v2817_v8, 3 }
  0x3b   : > { %v642_v47 = vunpack.c.l.b16 %v569_v43  ;;  %852 = vst.msk [vmem:[#allocation2 + $0xa1] sm:$0x1] %vm827_vm2, %v4042_v48 }
  0x3c   : > { %853 = vst.msk [vmem:[#allocation2 + $0xb9] sm:$0x1] %vm827_vm2, %v4042_v48 }
  0x3d   : > { %v658_v50 = vpack.c.b16 %v642_v47, %v641_v46  ;;  %854 = vst.msk [vmem:[#allocation2 + $0xd1] sm:$0x1] %vm827_vm2, %v4042_v48 }
  0x3e   : > { %855 = vst.msk [vmem:[#allocation2 + $0xe9] sm:$0x1] %vm827_vm2, %v4042_v48 }
  0x3f   : > { %856 = vst.msk [vmem:[#allocation2 + $0x101] sm:$0x1] %vm827_vm2, %v4042_v48 }
  0x40   : > { %857 = vst.msk [vmem:[#allocation2 + $0x119] sm:$0x1] %vm827_vm2, %v4042_v48 }
  0x41   : > { %858 = vst.msk [vmem:[#allocation2 + $0x131] sm:$0x1] %vm827_vm2, %v4042_v48 }
  0x42   : > { %859 = vst.msk [vmem:[#allocation2 + $0x149] sm:$0x1] %vm827_vm2, %v4042_v48 }
  0x43   : > { %860 = vst.msk [vmem:[#allocation2 + $0x161] sm:$0x1] %vm827_vm2, %v4042_v48 }
  0x44   : > { %861 = vst.msk [vmem:[#allocation2 + $0x179] sm:$0x1] %vm827_vm2, %v4042_v48 }
  0x45   : > { %862 = vst.msk [vmem:[#allocation2 + $0x191] sm:$0x1] %vm827_vm2, %v4042_v48 }
  0x46   : > { %863 = vst.msk [vmem:[#allocation2 + $0x1a9] sm:$0x1] %vm827_vm2, %v4042_v48 }
  0x48   : > { %2438 = vmatmul.msk.bf16.gmra.mxu0 %vm669_vm1, %v645_v56  ;;  %v553_v56 = vpack.c.bf16 %v521_v52, %v521_v52 }
  0x49   : > { %2447 = vmatmul.msk.bf16.gmra.mxu2 %vm669_vm1, %v654_v57  ;;  %v572_v57 = vpack.c.bf16 %v570_v53, %v570_v53 }
  0x4a   : > { %v626_v60 = vunpack.c.l.b16 %v553_v56 }
  0x4b   : > { %v661_v61 = vunpack.c.l.b16 %v572_v57 }
  0x4c   : > { %v650_v0 = vpack.c.b16 %v626_v60, %v625_v59 }
  0x4d   : > { %v663_v2 = vpack.c.b16 %v662_v62, %v661_v61  ;;  %v2888_v62 = vperm.slane %v2817_v8, 5 }
  0x58   : > { %2439 = vmatmul.msk.bf16.gmra.mxu0 %vm669_vm1, %v646_v6 }
  0x59   : > { %2448 = vmatmul.msk.bf16.gmra.mxu2 %vm669_vm1, %v655_v7 }
  0x68   : > { %2440 = vmatmul.msk.bf16.gmra.mxu0 %vm669_vm1, %v647_v20 }
  0x69   : > { %2449 = vmatmul.msk.bf16.gmra.mxu2 %vm669_vm1, %v656_v21 }
  0x78   : > { %2441 = vmatmul.msk.bf16.gmra.mxu0 %vm669_vm1, %v648_v34 }
  0x79   : > { %2450 = vmatmul.msk.bf16.gmra.mxu2 %vm669_vm1, %v657_v35 }
  0x88   : > { %2442 = vmatmul.msk.bf16.gmra.mxu0 %vm669_vm1, %v649_v49 }
  0x89   : > { %2451 = vmatmul.msk.bf16.gmra.mxu2 %vm669_vm1, %v658_v50 }
  0x95   : > { %v737_v1 = vpop.f32.mrf.mxu0 }
  0x96   : > { %v738_v3 = vadd.f32 %v2780_v63, %v737_v1 }
  0x98   : > { %865 = vst.msk [vmem:[#allocation2 + $0x1] sm:$0xff] %vm864_vm3, %v738_v3  ;;  %2443 = vmatmul.msk.bf16.gmra.mxu0 %vm669_vm1, %v650_v0  ;;  %v2891_v0 = vperm.slane %v2817_v8, 6 }
  0x99   : > { %905 = vst.msk [vmem:[#allocation2 + $0x1] sm:$0xff] %vm864_vm3, %v4042_v48  ;;  %2452 = vmatmul.msk.bf16.gmra.mxu2 %vm669_vm1, %v663_v2 }
  0x9c   : > { %v782_v4 = vpop.f32.mrf.mxu2 }
  0x9d   : > { %v783_v5 = vadd.f32 %v2780_v63, %v782_v4  ;;  %v739_v6 = vpop.f32.mrf.mxu0 }
  0x9e   : > { %v740_v7 = vadd.f32 %v2780_v63, %v739_v6 }
  0x9f   : > { %883 = vst.msk [vmem:[#allocation2 + $0xd9] sm:$0xff] %vm864_vm3, %v783_v5 }
  0xa0   : > { %866 = vst.msk [vmem:[#allocation2 + $0x9] sm:$0xff] %vm864_vm3, %v740_v7  ;;  %v913_v11 = vld [vmem:[#allocation2] sm:$0xff] }
  0xa1   : > { %906 = vst.msk [vmem:[#allocation2 + $0x9] sm:$0xff] %vm864_vm3, %v4042_v48  ;;  %v946_v16 = vmul.f32 %v2824_v9, %v913_v11  ;;  %v1013_v20 = vld [vmem:[#allocation2 + $0x1] sm:$0xff] }
  0xa2   : > { %v1046_v26 = vmul.f32 %v2844_v18, %v1013_v20 }
  0xa3   : > { %v981_v24 = vadd.f32 %v2841_v17, %v946_v16 }
  0xa4   : > { %v784_v10 = vpop.f32.mrf.mxu2 }
  0xa5   : > { %v785_v12 = vadd.f32 %v2780_v63, %v784_v10  ;;  %v742_v13 = vpop.f32.mrf.mxu0  ;;  %v1078_v39 = vadd.f32 %v1046_v26, %v981_v24 }
  0xa6   : > { %v743_v14 = vadd.f32 %v2780_v63, %v742_v13  ;;  %v931_v15 = vld [vmem:[#allocation2 + $0xd8] sm:$0xff] }
  0xa7   : > { %884 = vst.msk [vmem:[#allocation2 + $0xe1] sm:$0xff] %vm864_vm3, %v785_v12  ;;  %v964_v21 = vmul.f32 %v2824_v9, %v931_v15  ;;  %v1031_v23 = vld [vmem:[#allocation2 + $0xd9] sm:$0xff] }
  0xa8   : > { %867 = vst.msk [vmem:[#allocation2 + $0x19] sm:$0xff] %vm864_vm3, %v743_v14  ;;  %v914_v19 = vld [vmem:[#allocation2 + $0x8] sm:$0xff]  ;;  %v1064_v33 = vmul.f32 %v2844_v18, %v1031_v23 }
  0xa9   : > { %v947_v22 = vmul.f32 %v2824_v9, %v914_v19  ;;  %v1014_v25 = vld [vmem:[#allocation2 + $0x9] sm:$0xff]  ;;  %v999_v32 = vadd.f32 %v2841_v17, %v964_v21 }
  0xaa   : > { %v1110_v29 = vld [vmem:[#allocation2 + $0x2] sm:$0xff]  ;;  %v1047_v36 = vmul.f32 %v2844_v18, %v1014_v25  ;;  %v1111_v40 = vld [vmem:[#allocation2 + $0xa] sm:$0xff] }
  0xab   : > { %v982_v35 = vadd.f32 %v2841_v17, %v947_v22  ;;  %v1143_v41 = vmul.f32 %v2856_v27, %v1110_v29  ;;  %v1096_v46 = vadd.f32 %v1064_v33, %v999_v32  ;;  %v1144_v50 = vmul.f32 %v2856_v27, %v1111_v40 }
  0xac   : > { %v787_v28 = vpop.f32.mrf.mxu2 }
  0xad   : > { %v788_v30 = vadd.f32 %v2780_v63, %v787_v28  ;;  %v744_v31 = vpop.f32.mrf.mxu0  ;;  %v1079_v49 = vadd.f32 %v1047_v36, %v982_v35  ;;  %v1175_v52 = vadd.f32 %v1143_v41, %v1078_v39 }
  0xae   : > { %v745_v34 = vadd.f32 %v2780_v63, %v744_v31  ;;  %v932_v37 = vld [vmem:[#allocation2 + $0xe0] sm:$0xff] }
  0xaf   : > { %v1128_v38 = vld [vmem:[#allocation2 + $0xda] sm:$0xff]  ;;  %885 = vst.msk [vmem:[#allocation2 + $0xf1] sm:$0xff] %vm864_vm3, %v788_v30  ;;  %v965_v44 = vmul.f32 %v2824_v9, %v932_v37  ;;  %v1129_v55 = vld [vmem:[#allocation2 + $0xe2] sm:$0xff]  ;;  %v1176_v3 = vadd.f32 %v1144_v50, %v1079_v49 }
  0xb0   : > { %868 = vst.msk [vmem:[#allocation2 + $0x21] sm:$0xff] %vm864_vm3, %v745_v34  ;;  %v1208_v43 = vld [vmem:[#allocation2 + $0x18] sm:$0xff]  ;;  %v1032_v45 = vld [vmem:[#allocation2 + $0xe1] sm:$0xff]  ;;  %v1161_v47 = vmul.f32 %v2856_v27, %v1128_v38  ;;  %v1162_v5 = vmul.f32 %v2856_v27, %v1129_v55  ;;  %v2911_v34 = vperm.slane %v2817_v8, 7 }
  0xb1   : > { %v1241_v53 = vmul.f32 %v2873_v42, %v1208_v43  ;;  %v1305_v54 = vld [vmem:[#allocation2 + $0x19] sm:$0xff]  ;;  %v948_v56 = vmul.f32 %v1208_v43, %v2824_v9  ;;  %v1000_v58 = vadd.f32 %v2841_v17, %v965_v44  ;;  %v1065_v59 = vmul.f32 %v2844_v18, %v1032_v45 }
  0xb2   : > { %v1193_v1 = vadd.f32 %v1161_v47, %v1096_v46  ;;  %v1338_v4 = vmul.f32 %v2880_v51, %v1305_v54  ;;  %v1048_v22 = vmul.f32 %v1305_v54, %v2844_v18 }
  0xb3   : > { %v1273_v11 = vadd.f32 %v1241_v53, %v1175_v52  ;;  %v983_v15 = vadd.f32 %v2841_v17, %v948_v56  ;;  %v1097_v20 = vadd.f32 %v1065_v59, %v1000_v58 }
  0xb4   : > { %v789_v57 = vpop.f32.mrf.mxu2 }
  0xb5   : > { %v790_v60 = vadd.f32 %v2780_v63, %v789_v57  ;;  %v747_v61 = vpop.f32.mrf.mxu0  ;;  %v1370_v33 = vadd.f32 %v1338_v4, %v1273_v11  ;;  %v1080_v35 = vadd.f32 %v1048_v22, %v983_v15  ;;  %v1194_v40 = vadd.f32 %v1162_v5, %v1097_v20 }
  0xb6   : > { %v748_v2 = vadd.f32 %v2780_v63, %v747_v61  ;;  %v1226_v6 = vld [vmem:[#allocation2 + $0xf0] sm:$0xff] }
  0xb7   : > { %v1323_v7 = vld [vmem:[#allocation2 + $0xf1] sm:$0xff]  ;;  %886 = vst.msk [vmem:[#allocation2 + $0xf9] sm:$0xff] %vm864_vm3, %v790_v60  ;;  %v1209_v10 = vld [vmem:[#allocation2 + $0x20] sm:$0xff]  ;;  %v1259_v14 = vmul.f32 %v2873_v42, %v1226_v6  ;;  %v966_v16 = vmul.f32 %v1226_v6, %v2824_v9 }
  0xb8   : > { %v1306_v12 = vld [vmem:[#allocation2 + $0x21] sm:$0xff]  ;;  %869 = vst.msk [vmem:[#allocation2 + $0x31] sm:$0xff] %vm864_vm3, %v748_v2  ;;  %v1242_v19 = vmul.f32 %v2873_v42, %v1209_v10  ;;  %v949_v21 = vmul.f32 %v1209_v10, %v2824_v9  ;;  %v1356_v26 = vmul.f32 %v2880_v51, %v1323_v7  ;;  %v1066_v28 = vmul.f32 %v1323_v7, %v2844_v18 }
  0xb9   : > { %v1402_v13 = vld [vmem:[#allocation2 + $0x1a] sm:$0xff]  ;;  %v1403_v23 = vld [vmem:[#allocation2 + $0x22] sm:$0xff]  ;;  %v1291_v25 = vadd.f32 %v1259_v14, %v1193_v1  ;;  %v1339_v30 = vmul.f32 %v2880_v51, %v1306_v12  ;;  %v1001_v36 = vadd.f32 %v2841_v17, %v966_v16  ;;  %v1049_v41 = vmul.f32 %v1306_v12, %v2844_v18 }
  0xba   : > { %v1435_v24 = vmul.f32 %v2888_v62, %v1402_v13  ;;  %v1274_v29 = vadd.f32 %v1242_v19, %v1176_v3  ;;  %v984_v31 = vadd.f32 %v2841_v17, %v949_v21  ;;  %v1145_v32 = vmul.f32 %v1402_v13, %v2856_v27  ;;  %v2485_v2 = vld [vmem:[%s4039_s7 + $0x8] sm:$0xff] }
  0xbb   : > { %v1436_v39 = vmul.f32 %v2888_v62, %v1403_v23  ;;  %v1388_v46 = vadd.f32 %v1356_v26, %v1291_v25  ;;  %v1146_v47 = vmul.f32 %v1403_v23, %v2856_v27  ;;  %v1098_v55 = vadd.f32 %v1066_v28, %v1001_v36  ;;  %2169 = vmatpush.bf16.msra.mxu1 %v2485_v2  ;;  %v2951_v36 = vld [vmem:[%s4037_s5 + $0x8] ss:$0 sm:$0xff] }
  0xbc   : > { %v792_v37 = vpop.f32.mrf.mxu2  ;;  %v1371_v38 = vadd.f32 %v1339_v30, %v1274_v29  ;;  %v1467_v45 = vadd.f32 %v1435_v24, %v1370_v33  ;;  %v1081_v53 = vadd.f32 %v1049_v41, %v984_v31  ;;  %v1177_v54 = vadd.f32 %v1145_v32, %v1080_v35  ;;  %2488 = vmatpush.bf16.msra.mxu3 %v2485_v2  ;;  %v2484_v30 = vld [vmem:[%s4039_s7] sm:$0xff] }
  0xbd   : > { %v793_v43 = vadd.f32 %v2780_v63, %v792_v37  ;;  %v749_v44 = vpop.f32.mrf.mxu0 }
  0xbe   : > { %v750_v8 = vadd.f32 %v2780_v63, %v749_v44  ;;  %v1227_v49 = vld [vmem:[#allocation2 + $0xf8] sm:$0xff]  ;;  %v2920_v56 = vadd.f32 %v1436_v39, %v1371_v38  ;;  %v1178_v25 = vadd.f32 %v1146_v47, %v1081_v53 }
  0xbf   : > { %v1324_v50 = vld [vmem:[#allocation2 + $0xf9] sm:$0xff]  ;;  %887 = vst.msk [vmem:[#allocation2 + $0x109] sm:$0xff] %vm864_vm3, %v793_v43  ;;  %v1500_v57 = vld [vmem:[#allocation2 + $0x30] sm:$0xff]  ;;  %v1260_v59 = vmul.f32 %v2873_v42, %v1227_v49  ;;  %v967_v1 = vmul.f32 %v1227_v49, %v2824_v9  ;;  %2170 = vmatpush.bf16.msra.mxu1 %v2484_v30 }
  0xc0   : > { %v1420_v52 = vld [vmem:[#allocation2 + $0xf2] sm:$0xff]  ;;  %v1357_v60 = vmul.f32 %v2880_v51, %v1324_v50  ;;  %v1421_v61 = vld [vmem:[#allocation2 + $0xfa] sm:$0xff]  ;;  %870 = vst.msk [vmem:[#allocation2 + $0x39] sm:$0xff] %vm864_vm3, %v750_v8  ;;  %v1533_v3 = vmul.f32 %v2891_v0, %v1500_v57  ;;  %v1243_v6 = vmul.f32 %v1500_v57, %v2873_v42  ;;  %v1067_v15 = vmul.f32 %v1324_v50, %v2844_v18 }
  0xc1   : > { %v1597_v58 = vld [vmem:[#allocation2 + $0x31] sm:$0xff]  ;;  %v1453_v5 = vmul.f32 %v2888_v62, %v1420_v52  ;;  %v1292_v7 = vadd.f32 %v1260_v59, %v1194_v40  ;;  %v1454_v10 = vmul.f32 %v2888_v62, %v1421_v61  ;;  %v1002_v12 = vadd.f32 %v2841_v17, %v967_v1  ;;  %2489 = vmatpush.bf16.msra.mxu3 %v2484_v30 }
  0xc2   : > { %v1630_v4 = vmul.f32 %v2911_v34, %v1597_v58  ;;  %v1340_v11 = vmul.f32 %v1597_v58, %v2880_v51  ;;  %v1565_v13 = vadd.f32 %v1533_v3, %v1467_v45  ;;  %v1275_v14 = vadd.f32 %v1243_v6, %v1177_v54 }
  0xc3   : > { %v1389_v16 = vadd.f32 %v1357_v60, %v1292_v7  ;;  %v1163_v19 = vmul.f32 %v1420_v52, %v2856_v27  ;;  %v1164_v20 = vmul.f32 %v1421_v61, %v2856_v27  ;;  %v950_v21 = vmul.f32 %v1500_v57, %v2824_v9 }
  0xc4   : > { %v794_v22 = vpop.f32.mrf.mxu2  ;;  %v1662_v23 = vadd.f32 %v1630_v4, %v1565_v13  ;;  %v1485_v24 = vadd.f32 %v1453_v5, %v1388_v46  ;;  %v1099_v26 = vadd.f32 %v1067_v15, %v1002_v12  ;;  %v1372_v32 = vadd.f32 %v1340_v11, %v1275_v14 }
  0xc5   : > { %v795_v28 = vadd.f32 %v2780_v63, %v794_v22  ;;  %v752_v29 = vpop.f32.mrf.mxu0  ;;  %v2944_v31 = vadd.f32 %v1454_v10, %v1389_v16  ;;  %v1050_v33 = vmul.f32 %v1597_v58, %v2844_v18  ;;  %v1195_v39 = vadd.f32 %v1163_v19, %v1098_v55 }
  0xc6   : > { %v753_v35 = vadd.f32 %v2780_v63, %v752_v29  ;;  %v2953_v37 = vld [vmem:[#allocation2 + $0x108] sm:$0xff]  ;;  %v1196_v40 = vadd.f32 %v1164_v20, %v1099_v26  ;;  %v985_v41 = vadd.f32 %v2841_v17, %v950_v21 }
  0xc7   : > { %v2955_v38 = vld [vmem:[#allocation2 + $0x109] sm:$0xff]  ;;  %888 = vst.msk [vmem:[#allocation2 + $0x111] sm:$0xff] %vm864_vm3, %v795_v28  ;;  %v1501_v43 = vld [vmem:[#allocation2 + $0x38] sm:$0xff]  ;;  %v1551_v46 = vmul.f32 %v2891_v0, %v2953_v37  ;;  %v1261_v8 = vmul.f32 %v2953_v37, %v2873_v42 }
  0xc8   : > { %v1598_v44 = vld [vmem:[#allocation2 + $0x39] sm:$0xff]  ;;  %v1648_v47 = vmul.f32 %v2911_v34, %v2955_v38  ;;  %871 = vst.msk [vmem:[#allocation2 + $0x49] sm:$0xff] %vm864_vm3, %v753_v35  ;;  %v1534_v49 = vmul.f32 %v2891_v0, %v1501_v43  ;;  %v1244_v54 = vmul.f32 %v1501_v43, %v2873_v42  ;;  %v1358_v6 = vmul.f32 %v2955_v38, %v2880_v51 }
  0xc9   : > { %v2959_v45 = vld [vmem:[#allocation2 + $0x32] sm:$0xff]  ;;  %v1631_v50 = vmul.f32 %v2911_v34, %v1598_v44  ;;  %v2970_v52 = vld [vmem:[#allocation2 + $0x3a] sm:$0xff]  ;;  %v1583_v57 = vadd.f32 %v1551_v46, %v1485_v24  ;;  %v1341_v58 = vmul.f32 %v1598_v44, %v2880_v51  ;;  %v1293_v5 = vadd.f32 %v1261_v8, %v1195_v39 }
  0xca   : > { %v1727_v53 = vmul.f32 %v2951_v36, %v2959_v45  ;;  %v1728_v55 = vmul.f32 %v2951_v36, %v2970_v52  ;;  %v1437_v59 = vmul.f32 %v2959_v45, %v2888_v62  ;;  %v1566_v60 = vadd.f32 %v1534_v49, %v2920_v56 }
  0xcb   : > { %v1276_v1 = vadd.f32 %v1244_v54, %v1178_v25  ;;  %v1438_v2 = vmul.f32 %v2970_v52, %v2888_v62  ;;  %v1680_v3 = vadd.f32 %v1648_v47, %v1583_v57  ;;  %v2990_v56 = vmul.f32 %v1501_v43, %v2824_v9 }
  0xcc   : > { %v2981_v61 = vadd.f32 %v1727_v53, %v1662_v23  ;;  %v1469_v4 = vadd.f32 %v1437_v59, %v1372_v32  ;;  %v797_v7 = vpop.f32.mrf.mxu2  ;;  %v1663_v10 = vadd.f32 %v1631_v50, %v1566_v60  ;;  %v1390_v15 = vadd.f32 %v1358_v6, %v1293_v5 }
  0xcd   : > { %v1373_v12 = vadd.f32 %v1341_v58, %v1276_v1  ;;  %v798_v13 = vadd.f32 %v2780_v63, %v797_v7  ;;  %v754_v14 = vpop.f32.mrf.mxu0  ;;  %v2994_v16 = vmul.f32 %v1598_v44, %v2844_v18  ;;  %v2996_v19 = vadd.f32 %v1050_v33, %v985_v41 }
  0xce   : > { %v1791_v11 = vmul.f32 %v2981_v61, %v2981_v61  ;;  %v755_v20 = vadd.f32 %v2780_v63, %v754_v14  ;;  %v2999_v21 = vadd.f32 %v1728_v55, %v1663_v10  ;;  %v3002_v23 = vld [vmem:[#allocation2 + $0x110] sm:$0xff] }
  0xcf   : > { %v3004_v24 = vld [vmem:[#allocation2 + $0x111] sm:$0xff]  ;;  %v1470_v26 = vadd.f32 %v1438_v2, %v1373_v12  ;;  %889 = vst.msk [vmem:[#allocation2 + $0x121] sm:$0xff] %vm864_vm3, %v798_v13  ;;  %v1552_v28 = vmul.f32 %v2891_v0, %v3002_v23  ;;  %v3017_v33 = vld [vmem:[#allocation2 + $0x48] sm:$0xff]  ;;  %v1262_v39 = vmul.f32 %v3002_v23, %v2873_v42 }
  0xd0   : > { %v1823_v22 = vmul.f32 %v1791_v11, %v2981_v61  ;;  %v3006_v25 = vld [vmem:[#allocation2 + $0x10a] sm:$0xff]  ;;  %v1649_v29 = vmul.f32 %v2911_v34, %v3004_v24  ;;  %v3013_v30 = vld [vmem:[#allocation2 + $0x112] sm:$0xff]  ;;  %872 = vst.msk [vmem:[#allocation2 + $0x51] sm:$0xff] %vm864_vm3, %v755_v20  ;;  %v1792_v41 = vmul.f32 %v2999_v21, %v2999_v21  ;;  %v1535_v46 = vmul.f32 %v2891_v0, %v3017_v33 }
  0xd1   : > { %v1745_v32 = vmul.f32 %v2951_v36, %v3006_v25  ;;  %v3019_v35 = vld [vmem:[#allocation2 + $0x49] sm:$0xff]  ;;  %v1746_v44 = vmul.f32 %v2951_v36, %v3013_v30  ;;  %v1584_v47 = vadd.f32 %v1552_v28, %v2944_v31  ;;  %v1294_v50 = vadd.f32 %v1262_v39, %v1196_v40 }
  0xd2   : > { %v1855_v43 = vmul.f32 0.044715, %v1823_v22  ;;  %v1632_v49 = vmul.f32 %v2911_v34, %v3019_v35  ;;  %v1824_v53 = vmul.f32 %v1792_v41, %v2999_v21  ;;  %v1567_v55 = vadd.f32 %v1535_v46, %v1469_v4 }
  0xd3   : > { %v3031_v8 = vadd.f32 %v1745_v32, %v1680_v3  ;;  %v1359_v57 = vmul.f32 %v3004_v24, %v2880_v51  ;;  %v1681_v58 = vadd.f32 %v1649_v29, %v1584_v47  ;;  %v1455_v31 = vmul.f32 %v3006_v25, %v2888_v62 }
  0xd4   : > { %v1887_v54 = vadd.f32 %v1855_v43, %v2981_v61  ;;  %v1456_v60 = vmul.f32 %v3013_v30, %v2888_v62  ;;  %v799_v1 = vpop.f32.mrf.mxu2  ;;  %v1856_v40 = vmul.f32 0.044715, %v1824_v53  ;;  %v1664_v3 = vadd.f32 %v1632_v49, %v1567_v55 }
  0xd5   : > { %v1809_v59 = vmul.f32 %v3031_v8, %v3031_v8  ;;  %v1391_v5 = vadd.f32 %v1359_v57, %v1294_v50  ;;  %v800_v4 = vadd.f32 %v2780_v63, %v799_v1  ;;  %v757_v6 = vpop.f32.mrf.mxu0  ;;  %v3046_v7 = vadd.f32 %v1746_v44, %v1681_v58 }
  0xd6   : > { %v1919_v2 = vmul.f32 0.7978846, %v1887_v54  ;;  %v1487_v11 = vadd.f32 %v1455_v31, %v1390_v15  ;;  %v758_v12 = vadd.f32 %v2780_v63, %v757_v6  ;;  %v1888_v13 = vadd.f32 %v1856_v40, %v2999_v21  ;;  %v3051_v20 = vld [vmem:[#allocation2 + $0x120] sm:$0xff] }
  0xd7   : > { %v1841_v10 = vmul.f32 %v1809_v59, %v3031_v8  ;;  %v1488_v14 = vadd.f32 %v1456_v60, %v1391_v5  ;;  %v3053_v22 = vld [vmem:[#allocation2 + $0x121] sm:$0xff]  ;;  %890 = vst.msk [vmem:[#allocation2 + $0x129] sm:$0xff] %vm864_vm3, %v800_v4  ;;  %v1810_v28 = vmul.f32 %v3046_v7, %v3046_v7  ;;  %v3058_v32 = vld [vmem:[#allocation2 + $0x50] sm:$0xff]  ;;  %v1553_v41 = vmul.f32 %v2891_v0, %v3051_v20 }
  0xd8   : > { %2519 = vtanh.f32 %v1919_v2  ;;  %v3060_v39 = vld [vmem:[#allocation2 + $0x51] sm:$0xff]  ;;  %v1650_v43 = vmul.f32 %v2911_v34, %v3053_v22  ;;  %873 = vst.msk [vmem:[#allocation2 + $0x61] sm:$0xff] %vm864_vm3, %v758_v12  ;;  %v1920_v44 = vmul.f32 0.7978846, %v1888_v13  ;;  %v1536_v46 = vmul.f32 %v2891_v0, %v3058_v32 }
  0xd9   : > { %v1873_v29 = vmul.f32 0.044715, %v1841_v10  ;;  %v3062_v15 = vld [vmem:[#allocation2 + $0x4a] sm:$0xff]  ;;  %v1633_v47 = vmul.f32 %v2911_v34, %v3060_v39  ;;  %v3073_v49 = vld [vmem:[#allocation2 + $0x52] sm:$0xff]  ;;  %v1842_v53 = vmul.f32 %v1810_v28, %v3046_v7  ;;  %v1585_v57 = vadd.f32 %v1553_v41, %v1487_v11 }
  0xda   : > { %v1729_v50 = vmul.f32 %v2951_v36, %v3062_v15  ;;  %v1730_v55 = vmul.f32 %v2951_v36, %v3073_v49  ;;  %2521 = vtanh.f32 %v1920_v44  ;;  %v1568_v58 = vadd.f32 %v1536_v46, %v1470_v26 }
  0xdb   : > { %v1905_v54 = vadd.f32 %v1873_v29, %v3031_v8  ;;  %v986_v31 = vadd.f32 %v2841_v17, %v2990_v56  ;;  %v1874_v60 = vmul.f32 0.044715, %v1842_v53  ;;  %v1682_v40 = vadd.f32 %v1650_v43, %v1585_v57 }
  0xdc   : > { %v3081_v59 = vadd.f32 %v1729_v50, %v1664_v3  ;;  %v1147_v2 = vmul.f32 %v2959_v45, %v2856_v27  ;;  %v802_v4 = vpop.f32.mrf.mxu2  ;;  %v1665_v6 = vadd.f32 %v1633_v47, %v1568_v58  ;;  %v1148_v26 = vmul.f32 %v2970_v52, %v2856_v27 }
  0xdd   : > { %v1937_v1 = vmul.f32 0.7978846, %v1905_v54  ;;  %v1083_v11 = vadd.f32 %v2994_v16, %v986_v31  ;;  %v803_v3 = vadd.f32 %v2780_v63, %v802_v4  ;;  %v759_v56 = vpop.f32.mrf.mxu0  ;;  %v1906_v13 = vadd.f32 %v1874_v60, %v3046_v7 }
  0xde   : > { %v2520_v5 = vpop.eup %2519  ;;  %v1793_v10 = vmul.f32 %v3081_v59, %v3081_v59  ;;  %v760_v45 = vadd.f32 %v2780_v63, %v759_v56  ;;  %v3095_v28 = vadd.f32 %v1730_v55, %v1665_v6  ;;  %v3098_v41 = vld [vmem:[#allocation2 + $0x128] sm:$0xff]  ;;  %v1179_v52 = vadd.f32 %v1147_v2, %v2996_v19 }
  0xdf   : > { %v1983_v12 = vadd.f32 1.0, %v2520_v5  ;;  %2523 = vtanh.f32 %v1937_v1  ;;  %v3100_v43 = vld [vmem:[#allocation2 + $0x129] sm:$0xff]  ;;  %891 = vst.msk [vmem:[#allocation2 + $0x139] sm:$0xff] %vm864_vm3, %v803_v3  ;;  %v1938_v46 = vmul.f32 0.7978846, %v1906_v13  ;;  %v1554_v47 = vmul.f32 %v2891_v0, %v3098_v41 }
  0xe0   : > { %v1825_v29 = vmul.f32 %v1793_v10, %v3081_v59  ;;  %v3102_v16 = vld [vmem:[#allocation2 + $0x122] sm:$0xff]  ;;  %v1651_v50 = vmul.f32 %v2911_v34, %v3100_v43  ;;  %v3110_v53 = vld [vmem:[#allocation2 + $0x12a] sm:$0xff]  ;;  %v2522_v54 = vpop.eup %2521  ;;  %874 = vst.msk [vmem:[#allocation2 + $0x69] sm:$0xff] %vm864_vm3, %v760_v45  ;;  %v1794_v55 = vmul.f32 %v3095_v28, %v3095_v28  ;;  %v1180_v6 = vadd.f32 %v1148_v26, %v1083_v11 }
  0xe1   : > { %v2015_v44 = vmul.f32 0.5, %v1983_v12  ;;  %v1747_v19 = vmul.f32 %v2951_v36, %v3102_v16  ;;  %v1748_v58 = vmul.f32 %v2951_v36, %v3110_v53  ;;  %v1984_v31 = vadd.f32 1.0, %v2522_v54 }
  0xe2   : > { %v1857_v57 = vmul.f32 0.044715, %v1825_v29  ;;  %2525 = vtanh.f32 %v1938_v46  ;;  %v1586_v1 = vadd.f32 %v1554_v47, %v1488_v14  ;;  %v1826_v2 = vmul.f32 %v1794_v55, %v3095_v28 }
  0xe3   : > { %v2047_v60 = vmul.f32 %v2015_v44, %v2981_v61  ;;  %v3122_v4 = vadd.f32 %v1747_v19, %v1682_v40  ;;  %v2016_v3 = vmul.f32 0.5, %v1984_v31  ;;  %v1245_v12 = vmul.f32 %v3017_v33, %v2873_v42 }
  0xe4   : > { %v1889_v5 = vadd.f32 %v1857_v57, %v3081_v59  ;;  %v1683_v56 = vadd.f32 %v1651_v50, %v1586_v1  ;;  %v1246_v13 = vmul.f32 %v3058_v32, %v2873_v42  ;;  %v804_v45 = vpop.f32.mrf.mxu2  ;;  %v1858_v29 = vmul.f32 0.044715, %v1826_v2 }
  0xe5   : > { %v2524_v10 = vpop.eup %2523  ;;  %v1811_v44 = vmul.f32 %v3122_v4, %v3122_v4  ;;  %v805_v40 = vadd.f32 %v2780_v63, %v804_v45  ;;  %v762_v46 = vpop.f32.mrf.mxu0  ;;  %v2048_v11 = vmul.f32 %v2016_v3, %v2999_v21  ;;  %v1277_v47 = vadd.f32 %v1245_v12, %v1179_v52 }
  0xe6   : > { %v2001_v61 = vadd.f32 1.0, %v2524_v10  ;;  %v1921_v14 = vmul.f32 0.7978846, %v1889_v5  ;;  %v3132_v26 = vadd.f32 %v1748_v58, %v1683_v56  ;;  %v763_v50 = vadd.f32 %v2780_v63, %v762_v46  ;;  %v3144_v10 = vld [vmem:[#allocation2 + $0x60] sm:$0xff] }
  0xe7   : > { %v1890_v55 = vadd.f32 %v1858_v29, %v3095_v28  ;;  %892 = vst.msk [vmem:[#allocation2 + $0x141] sm:$0xff] %vm864_vm3, %v805_v40  ;;  %v2079_v19 = vpack.c.bf16 %v2048_v11, %v2047_v60  ;;  %v1843_v1 = vmul.f32 %v1811_v44, %v3122_v4  ;;  %v1278_v2 = vadd.f32 %v1246_v13, %v1180_v6  ;;  %v3152_v12 = vld [vmem:[#allocation2 + $0x68] sm:$0xff] }
  0xe8   : > { %v2033_v54 = vmul.f32 0.5, %v2001_v61  ;;  %2527 = vtanh.f32 %v1921_v14  ;;  %v2526_v57 = vpop.eup %2525  ;;  %v1812_v31 = vmul.f32 %v3132_v26, %v3132_v26  ;;  %875 = vst.msk [vmem:[#allocation2 + $0x79] sm:$0xff] %vm864_vm3, %v763_v50  ;;  %v1342_v5 = vmul.f32 %v3019_v35, %v2880_v51 }
  0xe9   : > { %v2002_v21 = vadd.f32 1.0, %v2526_v57  ;;  %v1922_v58 = vmul.f32 0.7978846, %v1890_v55  ;;  %2461 = vmatmul.msk.bf16.vlgmr.msra.gmra.mxu1 %vm864_vm3, %v2079_v19  ;;  %v1875_v3 = vmul.f32 0.044715, %v1843_v1  ;;  %v1343_v56 = vmul.f32 %v3060_v39, %v2880_v51  ;;  %v3164_v57 = vld [vmem:[#allocation2 + $0x69] sm:$0xff] }
  0xea   : > { %v2065_v52 = vmul.f32 %v2033_v54, %v3031_v8  ;;  %v1844_v60 = vmul.f32 %v1812_v31, %v3132_v26  ;;  %v1439_v6 = vmul.f32 %v3062_v15, %v2888_v62  ;;  %v3154_v8 = vld [vmem:[#allocation2 + $0x61] sm:$0xff]  ;;  %v1374_v45 = vadd.f32 %v1342_v5, %v1277_v47 }
  0xeb   : > { %v2034_v13 = vmul.f32 0.5, %v2002_v21  ;;  %2529 = vtanh.f32 %v1922_v58  ;;  %v1440_v61 = vmul.f32 %v3073_v49, %v2888_v62  ;;  %v1907_v14 = vadd.f32 %v1875_v3, %v3122_v4  ;;  %v3170_v58 = vld [vmem:[#allocation2 + $0x62] sm:$0xff] }
  0xec   : > { %v1876_v29 = vmul.f32 0.044715, %v1844_v60  ;;  %v1375_v44 = vadd.f32 %v1343_v56, %v1278_v2  ;;  %v1537_v40 = vmul.f32 %v2891_v0, %v3144_v10  ;;  %v807_v11 = vpop.f32.mrf.mxu2  ;;  %v1471_v54 = vadd.f32 %v1439_v6, %v1374_v45  ;;  %v3173_v56 = vld [vmem:[#allocation2 + $0x6a] sm:$0xff] }
  0xed   : > { %v2066_v50 = vmul.f32 %v2034_v13, %v3046_v7  ;;  %v1538_v55 = vmul.f32 %v2891_v0, %v3152_v12  ;;  %v1634_v47 = vmul.f32 %v2911_v34, %v3154_v8  ;;  %v808_v19 = vadd.f32 %v2780_v63, %v807_v11  ;;  %v764_v31 = vpop.f32.mrf.mxu0 }
  0xee   : > { %v2528_v46 = vpop.eup %2527  ;;  %v1908_v2 = vadd.f32 %v1876_v29, %v3132_v26  ;;  %v1939_v21 = vmul.f32 0.7978846, %v1907_v14  ;;  %v765_v7 = vadd.f32 %v2780_v63, %v764_v31  ;;  %v1472_v60 = vadd.f32 %v1440_v61, %v1375_v44 }
  0xef   : > { %v1985_v1 = vadd.f32 1.0, %v2528_v46  ;;  %v2088_v5 = vpack.c.bf16 %v2066_v50, %v2065_v52  ;;  %v1569_v3 = vadd.f32 %v1537_v40, %v1471_v54  ;;  %893 = vst.msk [vmem:[#allocation2 + $0x151] sm:$0xff] %vm864_vm3, %v808_v19  ;;  %v1635_v45 = vmul.f32 %v2911_v34, %v3164_v57 }
  0xf0   : > { %v1940_v13 = vmul.f32 0.7978846, %v1908_v2  ;;  %2531 = vtanh.f32 %v1939_v21  ;;  %876 = vst.msk [vmem:[#allocation2 + $0x81] sm:$0xff] %vm864_vm3, %v765_v7  ;;  %v1570_v29 = vadd.f32 %v1538_v55, %v1472_v60  ;;  %v1731_v52 = vmul.f32 %v2951_v36, %v3170_v58 }
  0xf1   : > { %v2017_v6 = vmul.f32 0.5, %v1985_v1  ;;  %v2530_v46 = vpop.eup %2529  ;;  %2470 = vmatmul.msk.bf16.vlgmr.msra.gmra.mxu3 %vm864_vm3, %v2088_v5  ;;  %v1666_v14 = vadd.f32 %v1634_v47, %v1569_v3  ;;  %v1732_v40 = vmul.f32 %v2951_v36, %v3173_v56  ;;  %v968_v54 = vmul.f32 %v2953_v37, %v2824_v9 }
  0xf2   : > { %v1986_v61 = vadd.f32 1.0, %v2530_v46  ;;  %2533 = vtanh.f32 %v1940_v13  ;;  %v1667_v11 = vadd.f32 %v1635_v45, %v1570_v29  ;;  %v969_v55 = vmul.f32 %v3002_v23, %v2824_v9 }
  0xf3   : > { %v2049_v44 = vmul.f32 %v2017_v6, %v3081_v59  ;;  %v3185_v50 = vadd.f32 %v1731_v52, %v1666_v14  ;;  %v1068_v19 = vmul.f32 %v2955_v38, %v2844_v18  ;;  %v1069_v59 = vmul.f32 %v3004_v24, %v2844_v18 }
  0xf4   : > { %v2018_v47 = vmul.f32 0.5, %v1986_v61  ;;  %v1165_v31 = vmul.f32 %v3006_v25, %v2856_v27  ;;  %v809_v1 = vpop.f32.mrf.mxu2  ;;  %v3197_v2 = vadd.f32 %v1732_v40, %v1667_v11  ;;  %v1003_v37 = vadd.f32 %v2841_v17, %v968_v54 }
  0xf5   : > { %v1795_v21 = vmul.f32 %v3185_v50, %v3185_v50  ;;  %v1004_v23 = vadd.f32 %v2841_v17, %v969_v55  ;;  %v810_v5 = vadd.f32 %v2780_v63, %v809_v1  ;;  %v767_v38 = vpop.f32.mrf.mxu0  ;;  %v1166_v24 = vmul.f32 %v3013_v30, %v2856_v27 }
  0xf6   : > { %v2532_v7 = vpop.eup %2531  ;;  %v2050_v60 = vmul.f32 %v2018_v47, %v3095_v28  ;;  %v1263_v25 = vmul.f32 %v3051_v20, %v2873_v42  ;;  %v768_v3 = vadd.f32 %v2780_v63, %v767_v38  ;;  %v1796_v13 = vmul.f32 %v3197_v2, %v3197_v2 }
  0xf7   : > { %v2003_v6 = vadd.f32 1.0, %v2532_v7  ;;  %v1827_v45 = vmul.f32 %v1795_v21, %v3185_v50  ;;  %894 = vst.msk [vmem:[#allocation2 + $0x159] sm:$0xff] %vm864_vm3, %v810_v5  ;;  %v1100_v14 = vadd.f32 %v1068_v19, %v1003_v37  ;;  %v1101_v28 = vadd.f32 %v1069_v59, %v1004_v23  ;;  %v3223_v19 = vld [vmem:[#allocation2 + $0x138] sm:$0xff]  ;;  %v3227_v23 = vld [vmem:[#allocation2 + $0x140] sm:$0xff] }
  0xf8   : > { %v2534_v46 = vpop.eup %2533  ;;  %v2080_v29 = vpack.c.bf16 %v2050_v60, %v2049_v44  ;;  %v1264_v30 = vmul.f32 %v3098_v41, %v2873_v42  ;;  %877 = vst.msk [vmem:[#allocation2 + $0x91] sm:$0xff] %vm864_vm3, %v768_v3  ;;  %v1828_v40 = vmul.f32 %v1796_v13, %v3197_v2  ;;  %v1360_v47 = vmul.f32 %v3053_v22, %v2880_v51  ;;  %v3237_v13 = vld [vmem:[#allocation2 + $0x139] sm:$0xff] }
  0xf9   : > { %v2004_v52 = vadd.f32 1.0, %v2534_v46  ;;  %v2035_v61 = vmul.f32 0.5, %v2003_v6  ;;  %v1859_v11 = vmul.f32 0.044715, %v1827_v45  ;;  %v1197_v54 = vadd.f32 %v1165_v31, %v1100_v14  ;;  %v3239_v45 = vld [vmem:[#allocation2 + $0x141] sm:$0xff] }
  0xfa   : > { %2462 = vmatmul.msk.bf16.gmra.mxu1 %vm864_vm3, %v2080_v29  ;;  %v1198_v55 = vadd.f32 %v1166_v24, %v1101_v28  ;;  %v1361_v44 = vmul.f32 %v3100_v43, %v2880_v51  ;;  %v1860_v21 = vmul.f32 0.044715, %v1828_v40  ;;  %v1457_v31 = vmul.f32 %v3102_v16, %v2888_v62 }
  0xfb   : > { %v2036_v59 = vmul.f32 0.5, %v2004_v52  ;;  %v2067_v1 = vmul.f32 %v2035_v61, %v3122_v4  ;;  %v1891_v37 = vadd.f32 %v1859_v11, %v3185_v50  ;;  %v1295_v7 = vadd.f32 %v1263_v25, %v1197_v54 }
  0xfc   : > { %v1296_v5 = vadd.f32 %v1264_v30, %v1198_v55  ;;  %v1458_v38 = vmul.f32 %v3110_v53, %v2888_v62  ;;  %v812_v60 = vpop.f32.mrf.mxu2  ;;  %v1892_v3 = vadd.f32 %v1860_v21, %v3197_v2  ;;  %v1555_v4 = vmul.f32 %v2891_v0, %v3223_v19  ;;  %v3244_v30 = vld [vmem:[#allocation2 + $0x13a] sm:$0xff] }
  0xfd   : > { %v2068_v24 = vmul.f32 %v2036_v59, %v3132_v26  ;;  %v1923_v6 = vmul.f32 0.7978846, %v1891_v37  ;;  %v813_v25 = vadd.f32 %v2780_v63, %v812_v60  ;;  %v769_v46 = vpop.f32.mrf.mxu0  ;;  %v1392_v29 = vadd.f32 %v1360_v47, %v1295_v7  ;;  %v3246_v26 = vld [vmem:[#allocation2 + $0x142] sm:$0xff] }
  0xfe   : > { %v1393_v14 = vadd.f32 %v1361_v44, %v1296_v5  ;;  %v1556_v28 = vmul.f32 %v2891_v0, %v3227_v23  ;;  %v770_v52 = vadd.f32 %v2780_v63, %v769_v46  ;;  %v1924_v40 = vmul.f32 0.7978846, %v1892_v3 }
  0xff   : > { %v2089_v61 = vpack.c.bf16 %v2068_v24, %v2067_v1  ;;  %2535 = vtanh.f32 %v1923_v6  ;;  %895 = vst.msk [vmem:[#allocation2 + $0x169] sm:$0xff] %vm864_vm3, %v813_v25  ;;  %v1489_v11 = vadd.f32 %v1457_v31, %v1392_v29  ;;  %v1652_v55 = vmul.f32 %v2911_v34, %v3237_v13 }
 0x100   : > { %v1490_v54 = vadd.f32 %v1458_v38, %v1393_v14  ;;  %v1653_v47 = vmul.f32 %v2911_v34, %v3239_v45  ;;  %878 = vst.msk [vmem:[#allocation2 + $0x99] sm:$0xff] %vm864_vm3, %v770_v52  ;;  %2537 = vtanh.f32 %v1924_v40  ;;  %v1749_v63 = vmul.f32 %v2951_v36, %v3244_v30  ;;  %v3292_v52 = vld [vmem:[#allocation2 + $0x78] sm:$0xff] }
 0x101   : > { %2471 = vmatmul.msk.bf16.gmra.mxu3 %vm864_vm3, %v2089_v61  ;;  %v1750_v44 = vmul.f32 %v2951_v36, %v3246_v26  ;;  %v952_v59 = vmul.f32 %v3017_v33, %v2824_v9  ;;  %v1587_v1 = vadd.f32 %v1555_v4, %v1489_v11  ;;  %v953_v37 = vmul.f32 %v3058_v32, %v2824_v9 }
 0x102   : > { %v1588_v21 = vadd.f32 %v1556_v28, %v1490_v54  ;;  %v1052_v7 = vmul.f32 %v3019_v35, %v2844_v18  ;;  %v1053_v31 = vmul.f32 %v3060_v39, %v2844_v18  ;;  %v1149_v38 = vmul.f32 %v3062_v15, %v2856_v27 }
 0x103   : > { %v987_v5 = vadd.f32 %v2841_v17, %v952_v59  ;;  %v1150_v60 = vmul.f32 %v3073_v49, %v2856_v27  ;;  %v1684_v33 = vadd.f32 %v1652_v55, %v1587_v1  ;;  %v988_v3 = vadd.f32 %v2841_v17, %v953_v37  ;;  %v3285_v49 = vld [vmem:[%s4036_s4] ss:$0 sm:$0xff] }
 0x104   : > { %v1685_v24 = vadd.f32 %v1653_v47, %v1588_v21  ;;  %v1247_v32 = vmul.f32 %v3144_v10, %v2873_v42  ;;  %v814_v35 = vpop.f32.mrf.mxu2  ;;  %v1248_v25 = vmul.f32 %v3152_v12, %v2873_v42  ;;  %v1344_v39 = vmul.f32 %v3154_v8, %v2880_v51  ;;  %v3302_v1 = vld [vmem:[#allocation2 + $0x80] sm:$0xff] }
 0x105   : > { %v2536_v6 = vpop.eup %2535  ;;  %v1084_v4 = vadd.f32 %v1052_v7, %v987_v5  ;;  %v1345_v15 = vmul.f32 %v3164_v57, %v2880_v51  ;;  %v815_v17 = vadd.f32 %v3285_v49, %v814_v35  ;;  %v772_v46 = vpop.f32.mrf.mxu0  ;;  %v3288_v14 = vadd.f32 %v1749_v63, %v1684_v33  ;;  %v3304_v21 = vld [vmem:[#allocation2 + $0x79] sm:$0xff] }
 0x106   : > { %v1987_v29 = vadd.f32 1.0, %v2536_v6  ;;  %v3290_v28 = vadd.f32 %v1750_v44, %v1685_v24  ;;  %v2538_v61 = vpop.eup %2537  ;;  %v773_v40 = vadd.f32 %v3285_v49, %v772_v46  ;;  %v1085_v11 = vadd.f32 %v1053_v31, %v988_v3  ;;  %v3316_v35 = vld [vmem:[#allocation2 + $0x7a] sm:$0xff] }
 0x107   : > { %v1181_v54 = vadd.f32 %v1149_v38, %v1084_v4  ;;  %v1441_v55 = vmul.f32 %v3170_v58, %v2888_v62  ;;  %896 = vst.msk [vmem:[#allocation2 + $0x171] sm:$0xff] %vm864_vm3, %v815_v17  ;;  %v1988_v47 = vadd.f32 1.0, %v2538_v61  ;;  %v1813_v63 = vmul.f32 %v3288_v14, %v3288_v14  ;;  %v3311_v38 = vld [vmem:[#allocation2 + $0x81] sm:$0xff] }
 0x108   : > { %v2019_v59 = vmul.f32 0.5, %v1987_v29  ;;  %v1814_v44 = vmul.f32 %v3290_v28, %v3290_v28  ;;  %879 = vst.msk [vmem:[#allocation2 + $0xa9] sm:$0xff] %vm864_vm3, %v773_v40  ;;  %v1182_v37 = vadd.f32 %v1150_v60, %v1085_v11  ;;  %v1442_v5 = vmul.f32 %v3173_v56, %v2888_v62  ;;  %v3318_v4 = vld [vmem:[#allocation2 + $0x82] sm:$0xff] }
 0x109   : > { %v1279_v7 = vadd.f32 %v1247_v32, %v1181_v54  ;;  %v1539_v31 = vmul.f32 %v2891_v0, %v3292_v52  ;;  %v2020_v33 = vmul.f32 0.5, %v1988_v47  ;;  %v1845_v3 = vmul.f32 %v1813_v63, %v3288_v14 }
 0x10a   : > { %v2051_v24 = vmul.f32 %v2019_v59, %v3185_v50  ;;  %v1846_v6 = vmul.f32 %v1814_v44, %v3290_v28  ;;  %v1280_v60 = vadd.f32 %v1248_v25, %v1182_v37  ;;  %v1540_v17 = vmul.f32 %v2891_v0, %v3302_v1 }
 0x10b   : > { %v1376_v32 = vadd.f32 %v1344_v39, %v1279_v7  ;;  %v1636_v46 = vmul.f32 %v2911_v34, %v3304_v21  ;;  %v2052_v29 = vmul.f32 %v2020_v33, %v3197_v2  ;;  %v1877_v61 = vmul.f32 0.044715, %v1845_v3 }
 0x10c   : > { %v1878_v50 = vmul.f32 0.044715, %v1846_v6  ;;  %v1637_v40 = vmul.f32 %v2911_v34, %v3311_v38  ;;  %v817_v11 = vpop.f32.mrf.mxu2  ;;  %v1377_v54 = vadd.f32 %v1345_v15, %v1280_v60  ;;  %v1733_v25 = vmul.f32 %v2951_v36, %v3316_v35 }
 0x10d   : > { %v1473_v47 = vadd.f32 %v1441_v55, %v1376_v32  ;;  %v1734_v39 = vmul.f32 %v2951_v36, %v3318_v4  ;;  %v2081_v59 = vpack.c.bf16 %v2052_v29, %v2051_v24  ;;  %v818_v63 = vadd.f32 %v3285_v49, %v817_v11  ;;  %v774_v44 = vpop.f32.mrf.mxu0 }
 0x10e   : > { %v1909_v2 = vadd.f32 %v1877_v61, %v3288_v14  ;;  %v1910_v37 = vadd.f32 %v1878_v50, %v3290_v28  ;;  %v775_v7 = vadd.f32 %v3285_v49, %v774_v44  ;;  %v1474_v33 = vadd.f32 %v1442_v5, %v1377_v54  ;;  %v3373_v44 = vld [vmem:[#allocation2 + $0x158] sm:$0xff] }
 0x10f   : > { %v1571_v3 = vadd.f32 %v1539_v31, %v1473_v47  ;;  %v970_v15 = vmul.f32 %v3051_v20, %v2824_v9  ;;  %2463 = vmatmul.msk.bf16.gmra.mxu1 %vm864_vm3, %v2081_v59  ;;  %897 = vst.msk [vmem:[#allocation2 + $0x181] sm:$0xff] %vm864_vm3, %v818_v63  ;;  %v971_v6 = vmul.f32 %v3098_v41, %v2824_v9  ;;  %v3347_v20 = vld [vmem:[%s4038_s6] ss:$0 sm:$0xff]  ;;  %v3371_v63 = vld [vmem:[#allocation2 + $0x150] sm:$0xff] }
 0x110   : > { %v1941_v55 = vmul.f32 0.7978846, %v1909_v2  ;;  %v1942_v24 = vmul.f32 0.7978846, %v1910_v37  ;;  %v1070_v60 = vmul.f32 %v3053_v22, %v2844_v18  ;;  %880 = vst.msk [vmem:[#allocation2 + $0xb1] sm:$0xff] %vm864_vm3, %v775_v7  ;;  %v1572_v32 = vadd.f32 %v1540_v17, %v1474_v33  ;;  %v3375_v2 = vld [vmem:[#allocation2 + $0x151] sm:$0xff] }
 0x111   : > { %v1668_v5 = vadd.f32 %v1636_v46, %v1571_v3  ;;  %v1005_v31 = vadd.f32 %v3347_v20, %v970_v15  ;;  %v1071_v29 = vmul.f32 %v3100_v43, %v2844_v18  ;;  %v1006_v41 = vadd.f32 %v3347_v20, %v971_v6  ;;  %4052 = vst [vmem:[#allocation3_spill] sm:$0xff] %v3375_v2 }
 0x112   : > { %2539 = vtanh.f32 %v1941_v55  ;;  %v1167_v22 = vmul.f32 %v3102_v16, %v2856_v27  ;;  %v1168_v17 = vmul.f32 %v3110_v53, %v2856_v27  ;;  %v1669_v46 = vadd.f32 %v1637_v40, %v1572_v32  ;;  %v3388_v32 = vld [vmem:[#allocation2 + $0x152] sm:$0xff] }
 0x113   : > { %2541 = vtanh.f32 %v1942_v24  ;;  %v3357_v61 = vadd.f32 %v1733_v25, %v1668_v5  ;;  %v1102_v50 = vadd.f32 %v1070_v60, %v1005_v31  ;;  %v1103_v11 = vadd.f32 %v1071_v29, %v1006_v41  ;;  %v3386_v60 = vld [vmem:[#allocation2 + $0x159] sm:$0xff] }
 0x114   : > { %v1265_v54 = vmul.f32 %v3223_v19, %v2873_v42  ;;  %v1266_v43 = vmul.f32 %v3227_v23, %v2873_v42  ;;  %v1362_v47 = vmul.f32 %v3237_v13, %v2880_v51  ;;  %v819_v59 = vpop.f32.mrf.mxu2  ;;  %v3365_v16 = vadd.f32 %v1734_v39, %v1669_v46 }
 0x115   : > { %v1797_v53 = vmul.f32 %v3357_v61, %v3357_v61  ;;  %v1199_v40 = vadd.f32 %v1167_v22, %v1102_v50  ;;  %v1363_v25 = vmul.f32 %v3239_v45, %v2880_v51  ;;  %v820_v37 = vadd.f32 %v3285_v49, %v819_v59  ;;  %v777_v7 = vpop.f32.mrf.mxu0  ;;  %v3399_v59 = vld [vmem:[#allocation2 + $0x15a] sm:$0xff] }
 0x116   : > { %v1200_v33 = vadd.f32 %v1168_v17, %v1103_v11  ;;  %v1459_v39 = vmul.f32 %v3244_v30, %v2888_v62  ;;  %v1460_v3 = vmul.f32 %v3246_v26, %v2888_v62  ;;  %v778_v15 = vadd.f32 %v3285_v49, %v777_v7 }
 0x117   : > { %v1798_v55 = vmul.f32 %v3365_v16, %v3365_v16  ;;  %v1829_v24 = vmul.f32 %v1797_v53, %v3357_v61  ;;  %v1297_v6 = vadd.f32 %v1265_v54, %v1199_v40  ;;  %898 = vst.msk [vmem:[#allocation2 + $0x189] sm:$0xff] %vm864_vm3, %v820_v37  ;;  %v1557_v29 = vmul.f32 %v2891_v0, %v3371_v63 }
 0x118   : > { %v2540_v5 = vpop.eup %2539  ;;  %v1298_v31 = vadd.f32 %v1266_v43, %v1200_v33  ;;  %v1558_v41 = vmul.f32 %v2891_v0, %v3373_v44  ;;  %v1654_v22 = vmul.f32 %v2911_v34, %v3375_v2  ;;  %881 = vst.msk [vmem:[#allocation2 + $0xc1] sm:$0xff] %vm864_vm3, %v778_v15  ;;  %v1655_v40 = vmul.f32 %v2911_v34, %v3386_v60 }
 0x119   : > { %v2542_v17 = vpop.eup %2541  ;;  %v2005_v46 = vadd.f32 1.0, %v2540_v5  ;;  %v1830_v50 = vmul.f32 %v1798_v55, %v3365_v16  ;;  %v1861_v11 = vmul.f32 0.044715, %v1829_v24  ;;  %v1394_v54 = vadd.f32 %v1362_v47, %v1297_v6 }
 0x11a   : > { %v2006_v43 = vadd.f32 1.0, %v2542_v17  ;;  %v1395_v53 = vadd.f32 %v1363_v25, %v1298_v31  ;;  %v1751_v37 = vmul.f32 %v2951_v36, %v3388_v32  ;;  %v1752_v47 = vmul.f32 %v2951_v36, %v3399_v59 }
 0x11b   : > { %v2037_v7 = vmul.f32 0.5, %v2005_v46  ;;  %v1862_v33 = vmul.f32 0.044715, %v1830_v50  ;;  %v1893_v5 = vadd.f32 %v1861_v11, %v3357_v61  ;;  %v1491_v48 = vadd.f32 %v1459_v39, %v1394_v54 }
 0x11c   : > { %v2038_v15 = vmul.f32 0.5, %v2006_v43  ;;  %v1492_v2 = vadd.f32 %v1460_v3, %v1395_v53  ;;  %v954_v55 = vmul.f32 %v3144_v10, %v2824_v9  ;;  %v822_v31 = vpop.f32.mrf.mxu2  ;;  %v955_v3 = vmul.f32 %v3152_v12, %v2824_v9 }
 0x11d   : > { %v2069_v25 = vmul.f32 %v2037_v7, %v3288_v14  ;;  %v1894_v24 = vadd.f32 %v1862_v33, %v3365_v16  ;;  %v1925_v6 = vmul.f32 0.7978846, %v1893_v5  ;;  %v1589_v17 = vadd.f32 %v1557_v29, %v1491_v48  ;;  %v779_v39 = vpop.f32.mrf.mxu0 }
 0x11e   : > { %v2070_v46 = vmul.f32 %v2038_v15, %v3290_v28  ;;  %v823_v50 = vadd.f32 %v3285_v49, %v822_v31  ;;  %v1590_v11 = vadd.f32 %v1558_v41, %v1492_v2  ;;  %v780_v10 = vadd.f32 %v3285_v49, %v779_v39  ;;  %v3448_v15 = vld [vmem:[#allocation2 + $0x90] sm:$0xff] }
 0x11f   : > { %v1926_v36 = vmul.f32 0.7978846, %v1894_v24  ;;  %2543 = vtanh.f32 %v1925_v6  ;;  %v1686_v54 = vadd.f32 %v1654_v22, %v1589_v17  ;;  %v989_v48 = vadd.f32 %v3347_v20, %v954_v55  ;;  %v3453_v17 = vld [vmem:[#allocation2 + $0x98] sm:$0xff] }
 0x120   : > { %v2090_v14 = vpack.c.bf16 %v2070_v46, %v2069_v25  ;;  %899 = vst.msk [vmem:[#allocation2 + $0x199] sm:$0xff] %vm864_vm3, %v823_v50  ;;  %v1687_v43 = vadd.f32 %v1655_v40, %v1590_v11  ;;  %v990_v28 = vadd.f32 %v3347_v20, %v955_v3  ;;  %v4053_v29 = vmov 0.0   ;;  %v3459_v3 = vld [vmem:[#allocation2 + $0x91] sm:$0xff] }
 0x121   : > { %2545 = vtanh.f32 %v1926_v36  ;;  %908 = vst.msk [vmem:[#allocation2 + $0x199] sm:$0xff] %vm864_vm3, %v4053_v29  ;;  %v3422_v2 = vadd.f32 %v1751_v37, %v1686_v54  ;;  %v1054_v12 = vmul.f32 %v3154_v8, %v2844_v18  ;;  %v1055_v41 = vmul.f32 %v3164_v57, %v2844_v18 }
 0x122   : > { %2472 = vmatmul.msk.bf16.gmra.mxu3 %vm864_vm3, %v2090_v14  ;;  %882 = vst.msk [vmem:[#allocation2 + $0xc9] sm:$0xff] %vm864_vm3, %v780_v10  ;;  %v3430_v22 = vadd.f32 %v1752_v47, %v1687_v43  ;;  %v1151_v53 = vmul.f32 %v3170_v58, %v2856_v27  ;;  %v1152_v40 = vmul.f32 %v3173_v56, %v2856_v27 }
 0x123   : > { %v1815_v37 = vmul.f32 %v3422_v2, %v3422_v2  ;;  %v1086_v7 = vadd.f32 %v1054_v12, %v989_v48  ;;  %v1087_v8 = vadd.f32 %v1055_v41, %v990_v28  ;;  %v1249_v57 = vmul.f32 %v3292_v52, %v2873_v42  ;;  %v3463_v48 = vld [vmem:[#allocation2 + $0x99] sm:$0xff] }
 0x124   : > { %v1816_v33 = vmul.f32 %v3430_v22, %v3430_v22  ;;  %v1250_v5 = vmul.f32 %v3302_v1, %v2873_v42  ;;  %v1346_v58 = vmul.f32 %v3304_v21, %v2880_v51  ;;  %v1347_v56 = vmul.f32 %v3311_v38, %v2880_v51  ;;  %v824_v25 = vpop.f32.mrf.mxu2 }
 0x125   : > { %v2544_v47 = vpop.eup %2543  ;;  %v1847_v55 = vmul.f32 %v1815_v37, %v3422_v2  ;;  %v1183_v24 = vadd.f32 %v1151_v53, %v1086_v7  ;;  %v1184_v6 = vadd.f32 %v1152_v40, %v1087_v8  ;;  %v1443_v31 = vmul.f32 %v3316_v35, %v2888_v62  ;;  %v3468_v53 = vld [vmem:[#allocation2 + $0x92] sm:$0xff] }
 0x126   : > { %v1989_v46 = vadd.f32 1.0, %v2544_v47  ;;  %v1848_v50 = vmul.f32 %v1816_v33, %v3430_v22  ;;  %v825_v39 = vadd.f32 %v3285_v49, %v824_v25  ;;  %v1444_v11 = vmul.f32 %v3318_v4, %v2888_v62 }
 0x127   : > { %v2546_v36 = vpop.eup %2545  ;;  %v1879_v10 = vmul.f32 0.044715, %v1847_v55  ;;  %v1281_v54 = vadd.f32 %v1249_v57, %v1183_v24  ;;  %v1282_v14 = vadd.f32 %v1250_v5, %v1184_v6  ;;  %v1541_v43 = vmul.f32 %v2891_v0, %v3448_v15  ;;  %v3475_v57 = vld [vmem:[#allocation2 + $0x9a] sm:$0xff] }
 0x128   : > { %v1990_v28 = vadd.f32 1.0, %v2546_v36  ;;  %v2021_v12 = vmul.f32 0.5, %v1989_v46  ;;  %v1880_v41 = vmul.f32 0.044715, %v1848_v50  ;;  %900 = vst.msk [vmem:[#allocation2 + $0x1a1] sm:$0xff] %vm864_vm3, %v825_v39  ;;  %v1542_v49 = vmul.f32 %v2891_v0, %v3453_v17 }
 0x129   : > { %v1911_v40 = vadd.f32 %v1879_v10, %v3422_v2  ;;  %909 = vst.msk [vmem:[#allocation2 + $0x1a1] sm:$0xff] %vm864_vm3, %v4053_v29  ;;  %v1378_v37 = vadd.f32 %v1346_v58, %v1281_v54  ;;  %v1379_v7 = vadd.f32 %v1347_v56, %v1282_v14  ;;  %v1638_v8 = vmul.f32 %v2911_v34, %v3459_v3  ;;  %v3484_v29 = vld [vmem:[%s4037_s5 + $0x8] ss:$0 sm:$0xff] }
 0x12a   : > { %v2022_v33 = vmul.f32 0.5, %v1990_v28  ;;  %v2053_v5 = vmul.f32 %v2021_v12, %v3357_v61  ;;  %v1912_v47 = vadd.f32 %v1880_v41, %v3430_v22  ;;  %v1639_v55 = vmul.f32 %v2911_v34, %v3463_v48 }
 0x12b   : > { %v1943_v25 = vmul.f32 0.7978846, %v1911_v40  ;;  %v1475_v24 = vadd.f32 %v1443_v31, %v1378_v37  ;;  %v1476_v6 = vadd.f32 %v1444_v11, %v1379_v7  ;;  %v1735_v58 = vmul.f32 %v3484_v29, %v3468_v53  ;;  %v3514_v37 = vld [vmem:[#allocation2 + $0x168] sm:$0xff]  ;;  %v3516_v7 = vld [vmem:[#allocation2 + $0x170] sm:$0xff] }
 0x12c   : > { %v2054_v56 = vmul.f32 %v2022_v33, %v3365_v16  ;;  %v1944_v46 = vmul.f32 0.7978846, %v1912_v47  ;;  %v1736_v61 = vmul.f32 %v3484_v29, %v3475_v57  ;;  %v972_v50 = vmul.f32 %v3223_v19, %v2824_v9 }
 0x12d   : > { %2547 = vtanh.f32 %v1943_v25  ;;  %v1573_v31 = vadd.f32 %v1541_v43, %v1475_v24  ;;  %v1574_v39 = vadd.f32 %v1542_v49, %v1476_v6  ;;  %v973_v11 = vmul.f32 %v3227_v23, %v2824_v9 }
 0x12e   : > { %v2082_v36 = vpack.c.bf16 %v2054_v56, %v2053_v5  ;;  %2549 = vtanh.f32 %v1944_v46  ;;  %v1007_v10 = vadd.f32 %v3347_v20, %v972_v50  ;;  %v1072_v16 = vmul.f32 %v3237_v13, %v2844_v18  ;;  %v3532_v56 = vld [vmem:[#allocation2 + $0x171] sm:$0xff] }
 0x12f   : > { %v1670_v54 = vadd.f32 %v1638_v8, %v1573_v31  ;;  %v1671_v14 = vadd.f32 %v1639_v55, %v1574_v39  ;;  %v1008_v28 = vadd.f32 %v3347_v20, %v973_v11  ;;  %v1073_v19 = vmul.f32 %v3239_v45, %v2844_v18 }
 0x130   : > { %2464 = vmatmul.msk.bf16.gmra.mxu1 %vm864_vm3, %v2082_v36  ;;  %v1104_v43 = vadd.f32 %v1072_v16, %v1007_v10  ;;  %v1169_v23 = vmul.f32 %v3244_v30, %v2856_v27  ;;  %v1170_v12 = vmul.f32 %v3246_v26, %v2856_v27  ;;  %v1267_v41 = vmul.f32 %v3371_v63, %v2873_v42  ;;  %v4054_v30 = vld [vmem:[#allocation3_spill] sm:$0xff] }
 0x131   : > { %v3508_v13 = vadd.f32 %v1735_v58, %v1670_v54  ;;  %v3510_v49 = vadd.f32 %v1736_v61, %v1671_v14  ;;  %v1105_v40 = vadd.f32 %v1073_v19, %v1008_v28  ;;  %v1268_v45 = vmul.f32 %v3373_v44, %v2873_v42  ;;  %v3530_v58 = vld [vmem:[#allocation2 + $0x169] sm:$0xff]  ;;  %v3542_v14 = vld [vmem:[#allocation2 + $0x172] sm:$0xff] }
 0x132   : > { %v1201_v8 = vadd.f32 %v1169_v23, %v1104_v43  ;;  %v1364_v33 = vmul.f32 %v4054_v30, %v2880_v51  ;;  %v1365_v26 = vmul.f32 %v3386_v60, %v2880_v51  ;;  %v1461_v5 = vmul.f32 %v3388_v32, %v2888_v62  ;;  %v3540_v54 = vld [vmem:[#allocation2 + $0x16a] sm:$0xff] }
 0x133   : > { %v2548_v47 = vpop.eup %2547  ;;  %v1799_v55 = vmul.f32 %v3508_v13, %v3508_v13  ;;  %v1800_v25 = vmul.f32 %v3510_v49, %v3510_v49  ;;  %v1202_v24 = vadd.f32 %v1170_v12, %v1105_v40  ;;  %v1462_v6 = vmul.f32 %v3399_v59, %v2888_v62 }
 0x134   : > { %v2550_v46 = vpop.eup %2549  ;;  %v2007_v61 = vadd.f32 1.0, %v2548_v47  ;;  %v1299_v50 = vadd.f32 %v1267_v41, %v1201_v8  ;;  %v1559_v31 = vmul.f32 %v2891_v0, %v3514_v37  ;;  %v1560_v39 = vmul.f32 %v2891_v0, %v3516_v7 }
 0x135   : > { %v2008_v11 = vadd.f32 1.0, %v2550_v46  ;;  %v1831_v36 = vmul.f32 %v1799_v55, %v3508_v13  ;;  %v1832_v10 = vmul.f32 %v1800_v25, %v3510_v49  ;;  %v1300_v16 = vadd.f32 %v1268_v45, %v1202_v24 }
 0x136   : > { %v2039_v28 = vmul.f32 0.5, %v2007_v61  ;;  %v1396_v19 = vadd.f32 %v1364_v33, %v1299_v50  ;;  %v1656_v43 = vmul.f32 %v2911_v34, %v3530_v58  ;;  %v1657_v23 = vmul.f32 %v2911_v34, %v3532_v56 }
 0x137   : > { %v2040_v12 = vmul.f32 0.5, %v2008_v11  ;;  %v1863_v41 = vmul.f32 0.044715, %v1831_v36  ;;  %v1864_v40 = vmul.f32 0.044715, %v1832_v10  ;;  %v1397_v8 = vadd.f32 %v1365_v26, %v1300_v16 }
 0x138   : > { %v2071_v47 = vmul.f32 %v2039_v28, %v3422_v2  ;;  %v1493_v55 = vadd.f32 %v1461_v5, %v1396_v19  ;;  %v1753_v45 = vmul.f32 %v3484_v29, %v3540_v54  ;;  %v1754_v25 = vmul.f32 %v3484_v29, %v3542_v14 }
 0x139   : > { %v2072_v33 = vmul.f32 %v2040_v12, %v3430_v22  ;;  %v1895_v24 = vadd.f32 %v1863_v41, %v3508_v13  ;;  %v1896_v46 = vadd.f32 %v1864_v40, %v3510_v49  ;;  %v1494_v61 = vadd.f32 %v1462_v6, %v1397_v8  ;;  %v3573_v12 = vld [vmem:[#allocation2 + $0xa8] sm:$0xff]  ;;  %v3583_v40 = vld [vmem:[#allocation2 + $0xb0] sm:$0xff] }
 0x13a   : > { %v1591_v50 = vadd.f32 %v1559_v31, %v1493_v55  ;;  %v956_v26 = vmul.f32 %v3292_v52, %v2824_v9  ;;  %v957_v2 = vmul.f32 %v3302_v1, %v2824_v9  ;;  %v1056_v5 = vmul.f32 %v3304_v21, %v2844_v18 }
 0x13b   : > { %v2091_v11 = vpack.c.bf16 %v2072_v33, %v2071_v47  ;;  %v1927_v36 = vmul.f32 0.7978846, %v1895_v24  ;;  %v1928_v10 = vmul.f32 0.7978846, %v1896_v46  ;;  %v1592_v16 = vadd.f32 %v1560_v39, %v1494_v61  ;;  %v3593_v33 = vld [vmem:[#allocation2 + $0xaa] sm:$0xff] }
 0x13c   : > { %v1688_v22 = vadd.f32 %v1656_v43, %v1591_v50  ;;  %v991_v28 = vadd.f32 %v3347_v20, %v956_v26  ;;  %v992_v19 = vadd.f32 %v3347_v20, %v957_v2  ;;  %v1057_v6 = vmul.f32 %v3311_v38, %v2844_v18  ;;  %4057 = vst [vmem:[#allocation5_spill] sm:$0xff] %v3593_v33 }
 0x13d   : > { %2473 = vmatmul.msk.bf16.gmra.mxu3 %vm864_vm3, %v2091_v11  ;;  %2551 = vtanh.f32 %v1927_v36  ;;  %v1689_v52 = vadd.f32 %v1657_v23, %v1592_v16  ;;  %v1153_v1 = vmul.f32 %v3316_v35, %v2856_v27  ;;  %v1154_v21 = vmul.f32 %v3318_v4, %v2856_v27  ;;  %v3606_v36 = vld [vmem:[#allocation2 + $0xb2] sm:$0xff] }
 0x13e   : > { %2553 = vtanh.f32 %v1928_v10  ;;  %v3571_v31 = vadd.f32 %v1753_v45, %v1688_v22  ;;  %v1088_v39 = vadd.f32 %v1056_v5, %v991_v28  ;;  %v1089_v43 = vadd.f32 %v1057_v6, %v992_v19  ;;  %v3589_v45 = vld [vmem:[#allocation2 + $0xa9] sm:$0xff] }
 0x13f   : > { %v3575_v41 = vadd.f32 %v1754_v25, %v1689_v52  ;;  %v1251_v38 = vmul.f32 %v3448_v15, %v2873_v42  ;;  %v1252_v23 = vmul.f32 %v3453_v17, %v2873_v42  ;;  %v1348_v35 = vmul.f32 %v3459_v3, %v2880_v51  ;;  %4055 = vst [vmem:[#allocation3_spill] sm:$0xff] %v3589_v45  ;;  %v3591_v25 = vld [vmem:[#allocation2 + $0xb1] sm:$0xff] }
 0x140   : > { %v1817_v4 = vmul.f32 %v3571_v31, %v3571_v31  ;;  %v1185_v8 = vadd.f32 %v1153_v1, %v1088_v39  ;;  %v1186_v47 = vadd.f32 %v1154_v21, %v1089_v43  ;;  %v1349_v55 = vmul.f32 %v3463_v48, %v2880_v51  ;;  %4056 = vst [vmem:[#allocation4_spill] sm:$0xff] %v3591_v25 }
 0x141   : > { %v1818_v24 = vmul.f32 %v3575_v41, %v3575_v41  ;;  %v1445_v46 = vmul.f32 %v3468_v53, %v2888_v62  ;;  %v1446_v61 = vmul.f32 %v3475_v57, %v2888_v62  ;;  %v1543_v50 = vmul.f32 %v2891_v0, %v3573_v12 }
 0x142   : > { %v1849_v26 = vmul.f32 %v1817_v4, %v3571_v31  ;;  %v1283_v2 = vadd.f32 %v1251_v38, %v1185_v8  ;;  %v1284_v5 = vadd.f32 %v1252_v23, %v1186_v47  ;;  %v1544_v11 = vmul.f32 %v2891_v0, %v3583_v40 }
 0x143   : > { %v2552_v10 = vpop.eup %2551  ;;  %v1850_v16 = vmul.f32 %v1818_v24, %v3575_v41  ;;  %v1640_v22 = vmul.f32 %v2911_v34, %v3589_v45  ;;  %v1641_v28 = vmul.f32 %v2911_v34, %v3591_v25  ;;  %v1737_v19 = vmul.f32 %v3484_v29, %v3593_v33 }
 0x144   : > { %v2554_v6 = vpop.eup %2553  ;;  %v1991_v52 = vadd.f32 1.0, %v2552_v10  ;;  %v1881_v1 = vmul.f32 0.044715, %v1849_v26  ;;  %v1380_v21 = vadd.f32 %v1348_v35, %v1283_v2  ;;  %v1381_v39 = vadd.f32 %v1349_v55, %v1284_v5 }
 0x145   : > { %v1992_v43 = vadd.f32 1.0, %v2554_v6  ;;  %v1882_v38 = vmul.f32 0.044715, %v1850_v16  ;;  %v1738_v23 = vmul.f32 %v3484_v29, %v3606_v36  ;;  %v974_v4 = vmul.f32 %v3371_v63, %v2824_v9 }
 0x146   : > { %v2023_v8 = vmul.f32 0.5, %v1991_v52  ;;  %v1913_v47 = vadd.f32 %v1881_v1, %v3571_v31  ;;  %v1477_v24 = vadd.f32 %v1445_v46, %v1380_v21  ;;  %v1478_v25 = vadd.f32 %v1446_v61, %v1381_v39 }
 0x147   : > { %v2024_v45 = vmul.f32 0.5, %v1992_v43  ;;  %v1914_v33 = vadd.f32 %v1882_v38, %v3575_v41  ;;  %v975_v35 = vmul.f32 %v3373_v44, %v2824_v9  ;;  %v1009_v55 = vadd.f32 %v3347_v20, %v974_v4  ;;  %v3656_v43 = vld [vmem:[#allocation2 + $0x181] sm:$0xff]  ;;  %v3658_v38 = vld [vmem:[#allocation2 + $0x189] sm:$0xff] }
 0x148   : > { %v2055_v26 = vmul.f32 %v2023_v8, %v3508_v13  ;;  %v1945_v2 = vmul.f32 0.7978846, %v1913_v47  ;;  %v1575_v5 = vadd.f32 %v1543_v50, %v1477_v24  ;;  %v1576_v10 = vadd.f32 %v1544_v11, %v1478_v25 }
 0x149   : > { %v2056_v63 = vmul.f32 %v2024_v45, %v3510_v49  ;;  %v1946_v16 = vmul.f32 0.7978846, %v1914_v33  ;;  %v1010_v6 = vadd.f32 %v3347_v20, %v975_v35  ;;  %v1074_v46 = vmul.f32 %v4054_v30, %v2844_v18  ;;  %v3639_v33 = vld [vmem:[#allocation2 + $0x180] sm:$0xff] }
 0x14a   : > { %2555 = vtanh.f32 %v1945_v2  ;;  %v1672_v61 = vadd.f32 %v1640_v22, %v1575_v5  ;;  %v1673_v52 = vadd.f32 %v1641_v28, %v1576_v10  ;;  %v1075_v44 = vmul.f32 %v3386_v60, %v2844_v18  ;;  %v3648_v28 = vld [vmem:[#allocation2 + $0x188] sm:$0xff] }
 0x14b   : > { %v2083_v1 = vpack.c.bf16 %v2056_v63, %v2055_v26  ;;  %2557 = vtanh.f32 %v1946_v16  ;;  %v1106_v13 = vadd.f32 %v1074_v46, %v1009_v55  ;;  %v1171_v25 = vmul.f32 %v3388_v32, %v2856_v27  ;;  %v3670_v5 = vld [vmem:[#allocation2 + $0x182] sm:$0xff]  ;;  %v3672_v10 = vld [vmem:[#allocation2 + $0x18a] sm:$0xff] }
 0x14c   : > { %v3633_v50 = vadd.f32 %v1737_v19, %v1672_v61  ;;  %v3635_v49 = vadd.f32 %v1738_v23, %v1673_v52  ;;  %v1107_v45 = vadd.f32 %v1075_v44, %v1010_v6  ;;  %v1172_v30 = vmul.f32 %v3399_v59, %v2856_v27 }
 0x14d   : > { %2465 = vmatmul.msk.bf16.gmra.mxu1 %vm864_vm3, %v2083_v1  ;;  %v1203_v11 = vadd.f32 %v1171_v25, %v1106_v13  ;;  %v1269_v60 = vmul.f32 %v3514_v37, %v2873_v42  ;;  %v1270_v22 = vmul.f32 %v3516_v7, %v2873_v42  ;;  %v1366_v32 = vmul.f32 %v3530_v58, %v2880_v51 }
 0x14e   : > { %v1801_v19 = vmul.f32 %v3633_v50, %v3633_v50  ;;  %v1802_v59 = vmul.f32 %v3635_v49, %v3635_v49  ;;  %v1204_v21 = vadd.f32 %v1172_v30, %v1107_v45  ;;  %v1367_v39 = vmul.f32 %v3532_v56, %v2880_v51 }
 0x14f   : > { %v1301_v23 = vadd.f32 %v1269_v60, %v1203_v11  ;;  %v1463_v4 = vmul.f32 %v3540_v54, %v2888_v62  ;;  %v1464_v8 = vmul.f32 %v3542_v14, %v2888_v62  ;;  %v1561_v47 = vmul.f32 %v2891_v0, %v3639_v33 }
 0x150   : > { %v2556_v24 = vpop.eup %2555  ;;  %v1833_v35 = vmul.f32 %v1801_v19, %v3633_v50  ;;  %v1834_v55 = vmul.f32 %v1802_v59, %v3635_v49  ;;  %v1302_v26 = vadd.f32 %v1270_v22, %v1204_v21  ;;  %v1562_v2 = vmul.f32 %v2891_v0, %v3648_v28 }
 0x151   : > { %v2558_v63 = vpop.eup %2557  ;;  %v2009_v16 = vadd.f32 1.0, %v2556_v24  ;;  %v1398_v6 = vadd.f32 %v1366_v32, %v1301_v23  ;;  %v1658_v46 = vmul.f32 %v2911_v34, %v3656_v43  ;;  %v1659_v61 = vmul.f32 %v2911_v34, %v3658_v38 }
 0x152   : > { %v2010_v52 = vadd.f32 1.0, %v2558_v63  ;;  %v1865_v44 = vmul.f32 0.044715, %v1833_v35  ;;  %v1866_v1 = vmul.f32 0.044715, %v1834_v55  ;;  %v1399_v13 = vadd.f32 %v1367_v39, %v1302_v26 }
 0x153   : > { %v2041_v25 = vmul.f32 0.5, %v2009_v16  ;;  %v1495_v45 = vadd.f32 %v1463_v4, %v1398_v6  ;;  %v1755_v30 = vmul.f32 %v3484_v29, %v3670_v5  ;;  %v1756_v11 = vmul.f32 %v3484_v29, %v3672_v10 }
 0x154   : > { %v2042_v60 = vmul.f32 0.5, %v2010_v52  ;;  %v1897_v22 = vadd.f32 %v1865_v44, %v3633_v50  ;;  %v1898_v32 = vadd.f32 %v1866_v1, %v3635_v49  ;;  %v1496_v19 = vadd.f32 %v1464_v8, %v1399_v13  ;;  %v3707_v52 = vld [vmem:[#allocation2 + $0xc0] sm:$0xff]  ;;  %v4058_v1 = vld [vmem:[#allocation3_spill] sm:$0xff] }
 0x155   : > { %v2073_v59 = vmul.f32 %v2041_v25, %v3571_v31  ;;  %v1593_v21 = vadd.f32 %v1561_v47, %v1495_v45  ;;  %v958_v39 = vmul.f32 %v3448_v15, %v2824_v9  ;;  %v959_v23 = vmul.f32 %v3453_v17, %v2824_v9  ;;  %v3715_v25 = vld [vmem:[#allocation2 + $0xc8] sm:$0xff] }
 0x156   : > { %v2074_v4 = vmul.f32 %v2042_v60, %v3575_v41  ;;  %v1929_v24 = vmul.f32 0.7978846, %v1897_v22  ;;  %v1930_v35 = vmul.f32 0.7978846, %v1898_v32  ;;  %v1594_v55 = vadd.f32 %v1562_v2, %v1496_v19  ;;  %v3717_v45 = vld [vmem:[#allocation2 + $0xc1] sm:$0xff]  ;;  %v3725_v19 = vld [vmem:[#allocation2 + $0xc9] sm:$0xff] }
 0x157   : > { %v1690_v26 = vadd.f32 %v1658_v46, %v1593_v21  ;;  %v993_v63 = vadd.f32 %v3347_v20, %v958_v39  ;;  %v994_v16 = vadd.f32 %v3347_v20, %v959_v23  ;;  %v1058_v31 = vmul.f32 %v3459_v3, %v2844_v18  ;;  %v4060_v22 = vld [vmem:[#allocation5_spill] sm:$0xff] }
 0x158   : > { %v2092_v8 = vpack.c.bf16 %v2074_v4, %v2073_v59  ;;  %2559 = vtanh.f32 %v1929_v24  ;;  %v1691_v47 = vadd.f32 %v1659_v61, %v1594_v55  ;;  %v1059_v15 = vmul.f32 %v3463_v48, %v2844_v18  ;;  %v3732_v4 = vld [vmem:[#allocation2 + $0xc2] sm:$0xff] }
 0x159   : > { %2561 = vtanh.f32 %v1930_v35  ;;  %v3696_v17 = vadd.f32 %v1755_v30, %v1690_v26  ;;  %v1090_v41 = vadd.f32 %v1058_v31, %v993_v63  ;;  %v1155_v2 = vmul.f32 %v3468_v53, %v2856_v27 }
 0x15a   : > { %2474 = vmatmul.msk.bf16.gmra.mxu3 %vm864_vm3, %v2092_v8  ;;  %v3701_v6 = vadd.f32 %v1756_v11, %v1691_v47  ;;  %v1091_v46 = vadd.f32 %v1059_v15, %v994_v16  ;;  %v1156_v3 = vmul.f32 %v3475_v57, %v2856_v27  ;;  %v1253_v61 = vmul.f32 %v3573_v12, %v2873_v42  ;;  %v4059_v11 = vld [vmem:[#allocation4_spill] sm:$0xff]  ;;  %v3739_v16 = vld [vmem:[#allocation2 + $0xca] sm:$0xff] }
 0x15b   : > { %v1819_v48 = vmul.f32 %v3696_v17, %v3696_v17  ;;  %v1187_v44 = vadd.f32 %v1155_v2, %v1090_v41  ;;  %v1254_v53 = vmul.f32 %v3583_v40, %v2873_v42  ;;  %v1350_v13 = vmul.f32 %v4058_v1, %v2880_v51 }
 0x15c   : > { %v1820_v57 = vmul.f32 %v3701_v6, %v3701_v6  ;;  %v1188_v30 = vadd.f32 %v1156_v3, %v1091_v46  ;;  %v1351_v60 = vmul.f32 %v4059_v11, %v2880_v51  ;;  %v1447_v32 = vmul.f32 %v4060_v22, %v2888_v62 }
 0x15d   : > { %v1851_v59 = vmul.f32 %v1819_v48, %v3696_v17  ;;  %v1285_v21 = vadd.f32 %v1253_v61, %v1187_v44  ;;  %v1448_v39 = vmul.f32 %v3606_v36, %v2888_v62  ;;  %v1545_v23 = vmul.f32 %v2891_v0, %v3707_v52 }
 0x15e   : > { %v2560_v24 = vpop.eup %2559  ;;  %v1852_v35 = vmul.f32 %v1820_v57, %v3701_v6  ;;  %v1286_v55 = vadd.f32 %v1254_v53, %v1188_v30  ;;  %v1546_v26 = vmul.f32 %v2891_v0, %v3715_v25  ;;  %v1642_v63 = vmul.f32 %v2911_v34, %v3717_v45 }
 0x15f   : > { %v2562_v31 = vpop.eup %2561  ;;  %v1993_v8 = vadd.f32 1.0, %v2560_v24  ;;  %v1883_v47 = vmul.f32 0.044715, %v1851_v59  ;;  %v1382_v15 = vadd.f32 %v1350_v13, %v1285_v21  ;;  %v1643_v41 = vmul.f32 %v2911_v34, %v3725_v19 }
 0x160   : > { %v1994_v2 = vadd.f32 1.0, %v2562_v31  ;;  %v1884_v46 = vmul.f32 0.044715, %v1852_v35  ;;  %v1383_v3 = vadd.f32 %v1351_v60, %v1286_v55  ;;  %v1739_v61 = vmul.f32 %v3484_v29, %v3732_v4 }
 0x161   : > { %v2025_v48 = vmul.f32 0.5, %v1993_v8  ;;  %v1915_v44 = vadd.f32 %v1883_v47, %v3696_v17  ;;  %v1479_v53 = vadd.f32 %v1447_v32, %v1382_v15  ;;  %v1740_v57 = vmul.f32 %v3484_v29, %v3739_v16 }
 0x162   : > { %v2026_v30 = vmul.f32 0.5, %v1994_v2  ;;  %v1916_v59 = vadd.f32 %v1884_v46, %v3701_v6  ;;  %v1480_v13 = vadd.f32 %v1448_v39, %v1383_v3  ;;  %v976_v21 = vmul.f32 %v3514_v37, %v2824_v9  ;;  %v1530_v3 = vld [vmem:[#allocation2 + $0x198] sm:$0xff] }
 0x163   : > { %v2057_v24 = vmul.f32 %v2025_v48, %v3633_v50  ;;  %v1947_v60 = vmul.f32 0.7978846, %v1915_v44  ;;  %v1577_v35 = vadd.f32 %v1545_v23, %v1479_v53  ;;  %v977_v55 = vmul.f32 %v3516_v7, %v2824_v9  ;;  %v1627_v53 = vld [vmem:[#allocation2 + $0x199] sm:$0xff] }
 0x164   : > { %v2058_v31 = vmul.f32 %v2026_v30, %v3635_v49  ;;  %v1948_v32 = vmul.f32 0.7978846, %v1916_v59  ;;  %v1578_v8 = vadd.f32 %v1546_v26, %v1480_v13  ;;  %v1011_v47 = vadd.f32 %v3347_v20, %v976_v21  ;;  %v1628_v59 = vld [vmem:[#allocation2 + $0x1a1] sm:$0xff] }
 0x165   : > { %2563 = vtanh.f32 %v1947_v60  ;;  %v1674_v15 = vadd.f32 %v1642_v63, %v1577_v35  ;;  %v1012_v39 = vadd.f32 %v3347_v20, %v977_v55  ;;  %v1076_v37 = vmul.f32 %v3530_v58, %v2844_v18  ;;  %v1724_v60 = vld [vmem:[#allocation2 + $0x19a] sm:$0xff] }
 0x166   : > { %v2084_v2 = vpack.c.bf16 %v2058_v31, %v2057_v24  ;;  %2565 = vtanh.f32 %v1948_v32  ;;  %v1675_v50 = vadd.f32 %v1643_v41, %v1578_v8  ;;  %v1077_v23 = vmul.f32 %v3532_v56, %v2844_v18  ;;  %v1725_v8 = vld [vmem:[#allocation2 + $0x1a2] sm:$0xff] }
 0x167   : > { %v3761_v7 = vadd.f32 %v1739_v61, %v1674_v15  ;;  %v1108_v49 = vadd.f32 %v1076_v37, %v1011_v47  ;;  %v1173_v26 = vmul.f32 %v3540_v54, %v2856_v27  ;;  %v1174_v63 = vmul.f32 %v3542_v14, %v2856_v27  ;;  %v1531_v61 = vld [vmem:[#allocation2 + $0x1a0] sm:$0xff] }
 0x168   : > { %2466 = vmatmul.msk.bf16.gmra.mxu1 %vm864_vm3, %v2084_v2  ;;  %v3768_v46 = vadd.f32 %v1740_v57, %v1675_v50  ;;  %v1109_v58 = vadd.f32 %v1077_v23, %v1012_v39  ;;  %v1271_v41 = vmul.f32 %v3639_v33, %v2873_v42  ;;  %v1272_v56 = vmul.f32 %v3648_v28, %v2873_v42 }
 0x169   : > { %v1803_v48 = vmul.f32 %v3761_v7, %v3761_v7  ;;  %v1205_v54 = vadd.f32 %v1173_v26, %v1108_v49  ;;  %v1368_v14 = vmul.f32 %v3656_v43, %v2880_v51  ;;  %v1369_v44 = vmul.f32 %v3658_v38, %v2880_v51 }
 0x16a   : > { %v1804_v57 = vmul.f32 %v3768_v46, %v3768_v46  ;;  %v1206_v33 = vadd.f32 %v1174_v63, %v1109_v58  ;;  %v1465_v28 = vmul.f32 %v3670_v5, %v2888_v62  ;;  %v1466_v30 = vmul.f32 %v3672_v10, %v2888_v62 }
 0x16b   : > { %v2564_v13 = vpop.eup %2563  ;;  %v1835_v21 = vmul.f32 %v1803_v48, %v3761_v7  ;;  %v1303_v24 = vadd.f32 %v1271_v41, %v1205_v54  ;;  %v1563_v43 = vmul.f32 %v2891_v0, %v1530_v3  ;;  %v1564_v38 = vmul.f32 %v2891_v0, %v1531_v61 }
 0x16c   : > { %v2566_v35 = vpop.eup %2565  ;;  %v2011_v55 = vadd.f32 1.0, %v2564_v13  ;;  %v1836_v31 = vmul.f32 %v1804_v57, %v3768_v46  ;;  %v1304_v32 = vadd.f32 %v1272_v56, %v1206_v33  ;;  %v1660_v5 = vmul.f32 %v2911_v34, %v1627_v53 }
 0x16d   : > { %v2012_v47 = vadd.f32 1.0, %v2566_v35  ;;  %v1867_v10 = vmul.f32 0.044715, %v1835_v21  ;;  %v1400_v15 = vadd.f32 %v1368_v14, %v1303_v24  ;;  %v1661_v39 = vmul.f32 %v2911_v34, %v1628_v59 }
 0x16e   : > { %v2043_v37 = vmul.f32 0.5, %v2011_v55  ;;  %v1868_v2 = vmul.f32 0.044715, %v1836_v31  ;;  %v1401_v50 = vadd.f32 %v1369_v44, %v1304_v32  ;;  %v1757_v23 = vmul.f32 %v3484_v29, %v1724_v60  ;;  %v3827_v55 = vld [vmem:[#allocation2 + $0xe0] sm:$0xff] }
 0x16f   : > { %v2044_v49 = vmul.f32 0.5, %v2012_v47  ;;  %v1899_v26 = vadd.f32 %v1867_v10, %v3761_v7  ;;  %v1497_v63 = vadd.f32 %v1465_v28, %v1400_v15  ;;  %v1758_v58 = vmul.f32 %v3484_v29, %v1725_v8  ;;  %v3835_v8 = vld [vmem:[#allocation2 + $0xd9] sm:$0xff] }
 0x170   : > { %v2075_v41 = vmul.f32 %v2043_v37, %v3696_v17  ;;  %v1900_v56 = vadd.f32 %v1868_v2, %v3768_v46  ;;  %v1498_v3 = vadd.f32 %v1466_v30, %v1401_v50  ;;  %v960_v61 = vmul.f32 %v3573_v12, %v2824_v9  ;;  %v3842_v2 = vld [vmem:[#allocation2 + $0xe1] sm:$0xff] }
 0x171   : > { %v2076_v48 = vmul.f32 %v2044_v49, %v3701_v6  ;;  %v1931_v54 = vmul.f32 0.7978846, %v1899_v26  ;;  %v1595_v14 = vadd.f32 %v1563_v43, %v1497_v63  ;;  %v961_v44 = vmul.f32 %v3583_v40, %v2824_v9 }
 0x172   : > { %v1932_v53 = vmul.f32 0.7978846, %v1900_v56  ;;  %v1596_v57 = vadd.f32 %v1564_v38, %v1498_v3  ;;  %v995_v33 = vadd.f32 %v3347_v20, %v960_v61  ;;  %v1060_v17 = vmul.f32 %v4058_v1, %v2844_v18  ;;  %v3821_v38 = vld [vmem:[#allocation2 + $0xd8] sm:$0xff] }
 0x173   : > { %v2093_v28 = vpack.c.bf16 %v2076_v48, %v2075_v41  ;;  %2567 = vtanh.f32 %v1931_v54  ;;  %v1692_v30 = vadd.f32 %v1660_v5, %v1595_v14  ;;  %v996_v59 = vadd.f32 %v3347_v20, %v961_v44  ;;  %v3851_v48 = vld [vmem:[#allocation2 + $0xe2] sm:$0xff] }
 0x174   : > { %2569 = vtanh.f32 %v1932_v53  ;;  %v1693_v12 = vadd.f32 %v1661_v39, %v1596_v57  ;;  %v1061_v6 = vmul.f32 %v4059_v11, %v2844_v18  ;;  %v1092_v13 = vadd.f32 %v1060_v17, %v995_v33 }
 0x175   : > { %2475 = vmatmul.msk.bf16.gmra.mxu3 %vm864_vm3, %v2093_v28  ;;  %v3809_v40 = vadd.f32 %v1757_v23, %v1692_v30  ;;  %v1157_v21 = vmul.f32 %v4060_v22, %v2856_v27  ;;  %v1255_v1 = vmul.f32 %v3707_v52, %v2873_v42  ;;  %v1158_v20 = vmul.f32 %v3606_v36, %v2856_v27 }
 0x176   : > { %v3815_v24 = vadd.f32 %v1758_v58, %v1693_v12  ;;  %v1093_v43 = vadd.f32 %v1061_v6, %v996_v59  ;;  %v1256_v11 = vmul.f32 %v3715_v25, %v2873_v42  ;;  %v1352_v22 = vmul.f32 %v3717_v45, %v2880_v51  ;;  %v3847_v58 = vld [vmem:[#allocation2 + $0xda] sm:$0xff] }
 0x177   : > { %v1821_v60 = vmul.f32 %v3809_v40, %v3809_v40  ;;  %v1189_v35 = vadd.f32 %v1157_v21, %v1092_v13  ;;  %v1353_v36 = vmul.f32 %v3725_v19, %v2880_v51  ;;  %v1449_v5 = vmul.f32 %v3732_v4, %v2888_v62 }
 0x178   : > { %v1822_v31 = vmul.f32 %v3815_v24, %v3815_v24  ;;  %v1190_v32 = vadd.f32 %v1158_v20, %v1093_v43  ;;  %v1450_v39 = vmul.f32 %v3739_v16, %v2888_v62  ;;  %v1547_v37 = vmul.f32 %v2891_v0, %v3821_v38  ;;  %v3866_v43 = vld [vmem:[%s4040_s8] ss:$0 sm:$0xff]  ;;  %v2172_v20 = vpop.f32.mrf.mxu1 }
 0x179   : > { %v2568_v47 = vpop.eup %2567  ;;  %v1853_v10 = vmul.f32 %v1821_v60, %v3809_v40  ;;  %v1287_v15 = vadd.f32 %v1255_v1, %v1189_v35  ;;  %v1548_v63 = vmul.f32 %v2891_v0, %v3827_v55  ;;  %v1644_v61 = vmul.f32 %v2911_v34, %v3835_v8 }
 0x17a   : > { %v2570_v50 = vpop.eup %2569  ;;  %v1995_v23 = vadd.f32 1.0, %v2568_v47  ;;  %v1854_v49 = vmul.f32 %v1822_v31, %v3815_v24  ;;  %v1288_v26 = vadd.f32 %v1256_v11, %v1190_v32  ;;  %v1645_v53 = vmul.f32 %v2911_v34, %v3842_v2 }
 0x17b   : > { %v1996_v41 = vadd.f32 1.0, %v2570_v50  ;;  %v1885_v56 = vmul.f32 0.044715, %v1853_v10  ;;  %v1384_v3 = vadd.f32 %v1352_v22, %v1287_v15  ;;  %v1741_v28 = vmul.f32 %v3484_v29, %v3847_v58 }
 0x17c   : > { %v2027_v54 = vmul.f32 0.5, %v1995_v23  ;;  %v1886_v14 = vmul.f32 0.044715, %v1854_v49  ;;  %v1385_v44 = vadd.f32 %v1353_v36, %v1288_v26  ;;  %v1742_v6 = vmul.f32 %v3484_v29, %v3851_v48  ;;  %v2586_v36 = vld [vmem:[%s4038_s6] ss:$0 sm:$0xff] }
 0x17d   : > { %v2028_v57 = vmul.f32 0.5, %v1996_v41  ;;  %v1917_v33 = vadd.f32 %v1885_v56, %v3809_v40  ;;  %v1481_v17 = vadd.f32 %v1449_v5, %v1384_v3  ;;  %v962_v11 = vmul.f32 %v3707_v52, %v2824_v9 }
 0x17e   : > { %v2059_v30 = vmul.f32 %v2027_v54, %v3761_v7  ;;  %v1918_v59 = vadd.f32 %v1886_v14, %v3815_v24  ;;  %v1482_v12 = vadd.f32 %v1450_v39, %v1385_v44  ;;  %v1062_v35 = vmul.f32 %v3717_v45, %v2844_v18  ;;  %v1516_v44 = vld [vmem:[#allocation2 + $0xf0] sm:$0xff] }
 0x17f   : > { %v2060_v13 = vmul.f32 %v2028_v57, %v3768_v46  ;;  %v1949_v21 = vmul.f32 0.7978846, %v1917_v33  ;;  %v1579_v1 = vadd.f32 %v1547_v37, %v1481_v17  ;;  %v963_v46 = vmul.f32 %v3715_v25, %v2824_v9 }
 0x180   : > { %v1950_v7 = vmul.f32 0.7978846, %v1918_v59  ;;  %v1580_v60 = vadd.f32 %v1548_v63, %v1482_v12  ;;  %v2173_v32 = vadd.f32 %v3866_v43, %v2172_v20  ;;  %v997_v5 = vadd.f32 %v2586_v36, %v962_v11  ;;  %v1613_v59 = vld [vmem:[#allocation2 + $0xf1] sm:$0xff]  ;;  %v1614_v12 = vld [vmem:[#allocation2 + $0xf9] sm:$0xff] }
 0x181   : > { %v2085_v22 = vpack.c.bf16 %v2060_v13, %v2059_v30  ;;  %2571 = vtanh.f32 %v1949_v21  ;;  %v1676_v31 = vadd.f32 %v1644_v61, %v1579_v1  ;;  %v998_v47 = vadd.f32 %v2586_v36, %v963_v46  ;;  %v1710_v21 = vld [vmem:[#allocation2 + $0xf2] sm:$0xff]  ;;  %v1711_v46 = vld [vmem:[#allocation2 + $0xfa] sm:$0xff] }
 0x182   : > { %2573 = vtanh.f32 %v1950_v7  ;;  %v1677_v52 = vadd.f32 %v1645_v53, %v1580_v60  ;;  %2252 = vst.msk [vmem:[%s3874_s13] sm:$0xff] %vm669_vm1, %v2173_v32  ;;  %v1063_v9 = vmul.f32 %v3725_v19, %v2844_v18  ;;  %v1159_v25 = vmul.f32 %v3732_v4, %v2856_v27  ;;  %v1517_v53 = vld [vmem:[#allocation2 + $0xf8] sm:$0xff] }
 0x183   : > { %2467 = vmatmul.msk.bf16.gmra.mxu1 %vm864_vm3, %v2085_v22  ;;  %v3885_v10 = vadd.f32 %v1741_v28, %v1676_v31  ;;  %v1094_v15 = vadd.f32 %v1062_v35, %v997_v5  ;;  %v1160_v50 = vmul.f32 %v3739_v16, %v2856_v27  ;;  %v1257_v18 = vmul.f32 %v3821_v38, %v2873_v42  ;;  %v2174_v31 = vpop.f32.mrf.mxu1 }
 0x184   : > { %v3893_v45 = vadd.f32 %v1742_v6, %v1677_v52  ;;  %v1095_v37 = vadd.f32 %v1063_v9, %v998_v47  ;;  %v1258_v63 = vmul.f32 %v3827_v55, %v2873_v42  ;;  %v1354_v27 = vmul.f32 %v3835_v8, %v2880_v51 }
 0x185   : > { %v1805_v39 = vmul.f32 %v3885_v10, %v3885_v10  ;;  %v1191_v49 = vadd.f32 %v1159_v25, %v1094_v15  ;;  %v1355_v38 = vmul.f32 %v3842_v2, %v2880_v51  ;;  %v1451_v42 = vmul.f32 %v3847_v58, %v2888_v62 }
 0x186   : > { %v1806_v23 = vmul.f32 %v3893_v45, %v3893_v45  ;;  %v1192_v26 = vadd.f32 %v1160_v50, %v1095_v37  ;;  %v1452_v8 = vmul.f32 %v3851_v48, %v2888_v62  ;;  %v1549_v2 = vmul.f32 %v2891_v0, %v1516_v44 }
 0x187   : > { %v2572_v19 = vpop.eup %2571  ;;  %v1837_v4 = vmul.f32 %v1805_v39, %v3885_v10  ;;  %v1289_v61 = vadd.f32 %v1257_v18, %v1191_v49  ;;  %v1550_v13 = vmul.f32 %v2891_v0, %v1517_v53  ;;  %v1646_v62 = vmul.f32 %v2911_v34, %v1613_v59 }
 0x188   : > { %v2574_v41 = vpop.eup %2573  ;;  %v2013_v56 = vadd.f32 1.0, %v2572_v19  ;;  %v1838_v3 = vmul.f32 %v1806_v23, %v3893_v45  ;;  %v1290_v14 = vadd.f32 %v1258_v63, %v1192_v26  ;;  %v1647_v48 = vmul.f32 %v2911_v34, %v1614_v12 }
 0x189   : > { %v2014_v16 = vadd.f32 1.0, %v2574_v41  ;;  %v1869_v54 = vmul.f32 0.044715, %v1837_v4  ;;  %v1386_v17 = vadd.f32 %v1354_v27, %v1289_v61  ;;  %v1743_v0 = vmul.f32 %v3484_v29, %v1710_v21 }
 0x18a   : > { %v2045_v57 = vmul.f32 0.5, %v2013_v56  ;;  %v1870_v33 = vmul.f32 0.044715, %v1838_v3  ;;  %v1387_v30 = vadd.f32 %v1355_v38, %v1290_v14  ;;  %v2175_v32 = vadd.f32 %v3866_v43, %v2174_v31 }
 0x18b   : > { %v2046_v55 = vmul.f32 0.5, %v2014_v16  ;;  %v1901_v28 = vadd.f32 %v1869_v54, %v3885_v10  ;;  %v1483_v51 = vadd.f32 %v1451_v42, %v1386_v17  ;;  %v1744_v34 = vmul.f32 %v3484_v29, %v1711_v46  ;;  %v2177_v18 = vpop.f32.mrf.mxu1 }
 0x18c   : > { %v1902_v6 = vadd.f32 %v1870_v33, %v3893_v45  ;;  %v2077_v1 = vmul.f32 %v2045_v57, %v3809_v40  ;;  %v1484_v11 = vadd.f32 %v1452_v8, %v1387_v30  ;;  %v2217_v40 = vpop.f32.mrf.mxu3  ;;  %2253 = vst.msk [vmem:[%s3874_s13 + $0x8] sm:$0xff] %vm669_vm1, %v2175_v32  ;;  %v2178_v26 = vadd.f32 %v3866_v43, %v2177_v18 }
 0x18d   : > { %v2078_v58 = vmul.f32 %v2046_v55, %v3815_v24  ;;  %v1933_v20 = vmul.f32 0.7978846, %v1901_v28  ;;  %v1581_v60 = vadd.f32 %v1549_v2, %v1483_v51  ;;  %v2218_v52 = vadd.f32 %v3866_v43, %v2217_v40 }
 0x18e   : > { %v1934_v7 = vmul.f32 0.7978846, %v1902_v6  ;;  %v1582_v22 = vadd.f32 %v1550_v13, %v1484_v11  ;;  %2254 = vst.msk [vmem:[%s3874_s13 + $0x10] sm:$0xff] %vm669_vm1, %v2178_v26 }
 0x18f   : > { %v2094_v35 = vpack.c.bf16 %v2078_v58, %v2077_v1  ;;  %2575 = vtanh.f32 %v1933_v20  ;;  %v1678_v24 = vadd.f32 %v1646_v62, %v1581_v60  ;;  %2270 = vst.msk [vmem:[%s3874_s13 + $0x90] sm:$0xff] %vm669_vm1, %v2218_v52 }
 0x190   : > { %2577 = vtanh.f32 %v1934_v7  ;;  %v1679_v36 = vadd.f32 %v1647_v48, %v1582_v22 }
 0x191   : > { %2476 = vmatmul.msk.bf16.gmra.mxu3 %vm864_vm3, %v2094_v35  ;;  %v1775_v5 = vadd.f32 %v1743_v0, %v1678_v24 }
 0x192   : > { %v1776_v47 = vadd.f32 %v1744_v34, %v1679_v36 }
 0x193   : > { %v1807_v9 = vmul.f32 %v1775_v5, %v1775_v5  ;;  %v2179_v44 = vpop.f32.mrf.mxu1 }
 0x194   : > { %v1808_v15 = vmul.f32 %v1776_v47, %v1776_v47  ;;  %v2219_v19 = vpop.f32.mrf.mxu3  ;;  %v2180_v57 = vadd.f32 %v3866_v43, %v2179_v44 }
 0x195   : > { %v2576_v25 = vpop.eup %2575  ;;  %v1839_v50 = vmul.f32 %v1807_v9, %v1775_v5  ;;  %v2220_v63 = vadd.f32 %v3866_v43, %v2219_v19 }
 0x196   : > { %v2578_v39 = vpop.eup %2577  ;;  %v1997_v37 = vadd.f32 1.0, %v2576_v25  ;;  %v1840_v49 = vmul.f32 %v1808_v15, %v1776_v47  ;;  %2255 = vst.msk [vmem:[%s3874_s13 + $0x18] sm:$0xff] %vm669_vm1, %v2180_v57 }
 0x197   : > { %v1998_v23 = vadd.f32 1.0, %v2578_v39  ;;  %v1871_v29 = vmul.f32 0.044715, %v1839_v50  ;;  %2271 = vst.msk [vmem:[%s3874_s13 + $0x98] sm:$0xff] %vm669_vm1, %v2220_v63 }
 0x198   : > { %v2029_v4 = vmul.f32 0.5, %v1997_v37  ;;  %v1872_v56 = vmul.f32 0.044715, %v1840_v49 }
 0x199   : > { %v2030_v41 = vmul.f32 0.5, %v1998_v23  ;;  %v1903_v3 = vadd.f32 %v1871_v29, %v1775_v5 }
 0x19a   : > { %v2061_v61 = vmul.f32 %v2029_v4, %v3885_v10  ;;  %v1904_v16 = vadd.f32 %v1872_v56, %v1776_v47 }
 0x19b   : > { %v2062_v27 = vmul.f32 %v2030_v41, %v3893_v45  ;;  %v1935_v54 = vmul.f32 0.7978846, %v1903_v3  ;;  %v2182_v28 = vpop.f32.mrf.mxu1 }
 0x19c   : > { %v1936_v38 = vmul.f32 0.7978846, %v1904_v16  ;;  %v2222_v53 = vpop.f32.mrf.mxu3  ;;  %v2183_v59 = vadd.f32 %v3866_v43, %v2182_v28 }
 0x19d   : > { %v2086_v14 = vpack.c.bf16 %v2062_v27, %v2061_v61  ;;  %2579 = vtanh.f32 %v1935_v54  ;;  %v2223_v33 = vadd.f32 %v3866_v43, %v2222_v53 }
 0x19e   : > { %2581 = vtanh.f32 %v1936_v38  ;;  %2256 = vst.msk [vmem:[%s3874_s13 + $0x20] sm:$0xff] %vm669_vm1, %v2183_v59 }
 0x19f   : > { %2468 = vmatmul.msk.bf16.gmra.mxu1 %vm864_vm3, %v2086_v14  ;;  %2272 = vst.msk [vmem:[%s3874_s13 + $0xa0] sm:$0xff] %vm669_vm1, %v2223_v33 }
 0x1a3   : > { %v2580_v10 = vpop.eup %2579  ;;  %v2184_v13 = vpop.f32.mrf.mxu1 }
 0x1a4   : > { %v2582_v45 = vpop.eup %2581  ;;  %v1999_v17 = vadd.f32 1.0, %v2580_v10  ;;  %v2224_v30 = vpop.f32.mrf.mxu3  ;;  %v2185_v1 = vadd.f32 %v3866_v43, %v2184_v13 }
 0x1a5   : > { %v2000_v42 = vadd.f32 1.0, %v2582_v45  ;;  %v2225_v12 = vadd.f32 %v3866_v43, %v2224_v30 }
 0x1a6   : > { %v2031_v55 = vmul.f32 0.5, %v1999_v17  ;;  %2257 = vst.msk [vmem:[%s3874_s13 + $0x28] sm:$0xff] %vm669_vm1, %v2185_v1 }
 0x1a7   : > { %v2032_v8 = vmul.f32 0.5, %v2000_v42  ;;  %2273 = vst.msk [vmem:[%s3874_s13 + $0xa8] sm:$0xff] %vm669_vm1, %v2225_v12 }
 0x1a8   : > { %v2063_v51 = vmul.f32 %v2031_v55, %v1775_v5 }
 0x1a9   : > { %v2064_v6 = vmul.f32 %v2032_v8, %v1776_v47 }
 0x1ab   : > { %v2087_v2 = vpack.c.bf16 %v2064_v6, %v2063_v51 }
 0x1ac   : > { %v2227_v21 = vpop.f32.mrf.mxu3 }
 0x1ad   : > { %v2228_v58 = vadd.f32 %v3866_v43, %v2227_v21  ;;  %v2187_v20 = vpop.f32.mrf.mxu1 }
 0x1ae   : > { %v2188_v7 = vadd.f32 %v3866_v43, %v2187_v20 }
 0x1af   : > { %2469 = vmatmul.msk.bf16.gmra.mxu1 %vm864_vm3, %v2087_v2  ;;  %2274 = vst.msk [vmem:[%s3874_s13 + $0xb0] sm:$0xff] %vm669_vm1, %v2228_v58 }
 0x1b0   : > { %2258 = vst.msk [vmem:[%s3874_s13 + $0x30] sm:$0xff] %vm669_vm1, %v2188_v7 }
 0x1b4   : > { %v2229_v11 = vpop.f32.mrf.mxu3 }
 0x1b5   : > { %v2230_v60 = vadd.f32 %v3866_v43, %v2229_v11  ;;  %v2189_v62 = vpop.f32.mrf.mxu1 }
 0x1b6   : > { %v2190_v48 = vadd.f32 %v3866_v43, %v2189_v62 }
 0x1b7   : > { %2275 = vst.msk [vmem:[%s3874_s13 + $0xb8] sm:$0xff] %vm669_vm1, %v2230_v60 }
 0x1b8   : > { %2259 = vst.msk [vmem:[%s3874_s13 + $0x38] sm:$0xff] %vm669_vm1, %v2190_v48 }
 0x1c0   : > { %v2232_v46 = vpop.f32.mrf.mxu3 }
 0x1c1   : > { %v2233_v35 = vadd.f32 %v3866_v43, %v2232_v46 }
 0x1c3   : > { %2276 = vst.msk [vmem:[%s3874_s13 + $0xc0] sm:$0xff] %vm669_vm1, %v2233_v35 }
 0x1c8   : > { %v2234_v22 = vpop.f32.mrf.mxu3 }
 0x1c9   : > { %v2235_v0 = vadd.f32 %v3866_v43, %v2234_v22 }
 0x1ca   : > { %v2192_v31 = vpop.f32.mrf.mxu1 }
 0x1cb   : > { %v2193_v40 = vadd.f32 %v3866_v43, %v2192_v31  ;;  %2277 = vst.msk [vmem:[%s3874_s13 + $0xc8] sm:$0xff] %vm669_vm1, %v2235_v0 }
 0x1cd   : > { %2260 = vst.msk [vmem:[%s3874_s13 + $0x40] sm:$0xff] %vm669_vm1, %v2193_v40 }
 0x1d2   : > { %v2194_v24 = vpop.f32.mrf.mxu1 }
 0x1d3   : > { %v2195_v32 = vadd.f32 %v3866_v43, %v2194_v24 }
 0x1d5   : > { %2261 = vst.msk [vmem:[%s3874_s13 + $0x48] sm:$0xff] %vm669_vm1, %v2195_v32 }
 0x1dd   : > { %v2237_v52 = vpop.f32.mrf.mxu3 }
 0x1de   : > { %v2238_v36 = vadd.f32 %v3866_v43, %v2237_v52 }
 0x1e0   : > { %2278 = vst.msk [vmem:[%s3874_s13 + $0xd0] sm:$0xff] %vm669_vm1, %v2238_v36 }
 0x1e5   : > { %v2197_v34 = vpop.f32.mrf.mxu1  ;;  %v2239_v5 = vpop.f32.mrf.mxu3 }
 0x1e6   : > { %v2198_v47 = vadd.f32 %v3866_v43, %v2197_v34  ;;  %v2240_v9 = vadd.f32 %v3866_v43, %v2239_v5 }
 0x1e8   : > { %2262 = vst.msk [vmem:[%s3874_s13 + $0x50] sm:$0xff] %vm669_vm1, %v2198_v47 }
 0x1e9   : > { %2279 = vst.msk [vmem:[%s3874_s13 + $0xd8] sm:$0xff] %vm669_vm1, %v2240_v9 }
 0x1ed   : > { %v2199_v25 = vpop.f32.mrf.mxu1 }
 0x1ee   : > { %v2200_v15 = vadd.f32 %v3866_v43, %v2199_v25 }
 0x1f0   : > { %2263 = vst.msk [vmem:[%s3874_s13 + $0x58] sm:$0xff] %vm669_vm1, %v2200_v15 }
 0x1f8   : > { %v2242_v39 = vpop.f32.mrf.mxu3 }
 0x1f9   : > { %v2243_v37 = vadd.f32 %v3866_v43, %v2242_v39 }
 0x1fb   : > { %2280 = vst.msk [vmem:[%s3874_s13 + $0xe0] sm:$0xff] %vm669_vm1, %v2243_v37 }
 0x200   : > { %v2202_v50 = vpop.f32.mrf.mxu1  ;;  %v2244_v23 = vpop.f32.mrf.mxu3 }
 0x201   : > { %v2203_v49 = vadd.f32 %v3866_v43, %v2202_v50  ;;  %v2245_v18 = vadd.f32 %v3866_v43, %v2244_v23 }
 0x203   : > { %2264 = vst.msk [vmem:[%s3874_s13 + $0x60] sm:$0xff] %vm669_vm1, %v2203_v49 }
 0x204   : > { %2281 = vst.msk [vmem:[%s3874_s13 + $0xe8] sm:$0xff] %vm669_vm1, %v2245_v18 }
 0x208   : > { %v2204_v19 = vpop.f32.mrf.mxu1 }
 0x209   : > { %v2205_v4 = vadd.f32 %v3866_v43, %v2204_v19 }
 0x20b   : > { %2265 = vst.msk [vmem:[%s3874_s13 + $0x68] sm:$0xff] %vm669_vm1, %v2205_v4 }
 0x214   : > { %v2247_v29 = vpop.f32.mrf.mxu3 }
 0x215   : > { %v2248_v26 = vadd.f32 %v3866_v43, %v2247_v29 }
 0x217   : > { %2282 = vst.msk [vmem:[%s3874_s13 + $0xf0] sm:$0xff] %vm669_vm1, %v2248_v26 }
 0x21c   : > { %v2207_v63 = vpop.f32.mrf.mxu1  ;;  %v2249_v41 = vpop.f32.mrf.mxu3 }
 0x21d   : > { %v2208_v56 = vadd.f32 %v3866_v43, %v2207_v63  ;;  %v2250_v3 = vadd.f32 %v3866_v43, %v2249_v41 }
 0x21f   : > { %2266 = vst.msk [vmem:[%s3874_s13 + $0x70] sm:$0xff] %vm669_vm1, %v2208_v56 }
 0x220   : > { %2283 = vst.msk [vmem:[%s3874_s13 + $0xf8] sm:$0xff] %vm669_vm1, %v2250_v3 }
 0x224   : > { %v2209_v61 = vpop.f32.mrf.mxu1 }
 0x225   : > { %v2210_v27 = vadd.f32 %v3866_v43, %v2209_v61 }
 0x227   : > { %2267 = vst.msk [vmem:[%s3874_s13 + $0x78] sm:$0xff] %vm669_vm1, %v2210_v27 }
 0x22c   : > { %v2212_v16 = vpop.f32.mrf.mxu1 }
 0x22d   : > { %v2213_v54 = vadd.f32 %v3866_v43, %v2212_v16 }
 0x22f   : > { %2268 = vst.msk [vmem:[%s3874_s13 + $0x80] sm:$0xff] %vm669_vm1, %v2213_v54 }
 0x234   : > { %v2214_v14 = vpop.f32.mrf.mxu1 }
 0x235   : > { %v2215_v38 = vadd.f32 %v3866_v43, %v2214_v14 }
 0x237   : > { %2269 = vst.msk [vmem:[%s3874_s13 + $0x88] sm:$0xff] %vm669_vm1, %v2215_v38 }
 0x238 PF: > { %s19_s11 = sadd.s32 1, %s2609_s11   ;;  %s4061_s30 = smov %s2605_s10 }
 0x239   : > { %p16_p5 = scmp.ge.s32.totalorder %s19_s11, 4   ;;  %s4062_s10 = smov %s4064_s12 }
 0x23b   :  { %18 = sbr.rel (!%p16_p5) target bundleno = 2 (0x2), region = 99 }

</bundles_post_ra>
